<compile_context>
chip_gen: v6e
topology: v6e:2x2x1
jax: 0.10.0
libtpu: 0.0.40
codegen_flags: <defaults>
</compile_context>

<pallas_src>
import functools

import jax
import jax.numpy as jnp
from jax.experimental import pallas as pl
from jax.experimental.pallas import tpu as pltpu

SEQUENCE_LENGTH = 5
FEATURE_CHANNELS = [8, 16, 32, 32]   # encoder feature_channels_list (scales /2 /4 /8 /16)
HIDDEN_CHANNELS = [32, 16, 8]        # decoder hidden_channels_list
EPS = 1e-6
TM_MAX = 4096                        # max pixels per block column-tile

_PARALLEL = pltpu.CompilerParams(dimension_semantics=("parallel",))


# ----------------------------------------------------------------------------
# Pallas kernels (channel-first: blocks are (channels, pixel_tile))
# ----------------------------------------------------------------------------
def _conv_kernel(x_ref, w_ref, b_ref, o_ref, *, act):
    """o = act(W @ x + b); 1x1 conv with lane-dense (Cout, TM) output, bf16 in/out."""
    cin = x_ref.shape[0]
    if cin <= 4:
        # K<=4 contraction as broadcast FMAs on the VPU (MXU fill would be <3%).
        x32 = x_ref[...].astype(jnp.float32)
        w32 = w_ref[...].astype(jnp.float32)
        y = b_ref[...] + w32[:, 0:1] * x32[0:1, :]
        for k in range(1, cin):
            y = y + w32[:, k:k + 1] * x32[k:k + 1, :]
    else:
        y = jnp.dot(w_ref[...], x_ref[...], preferred_element_type=jnp.float32)
        y = y + b_ref[...]
    if act == "relu":
        y = jnp.maximum(y, 0.0)
    elif act == "sigmoid":
        y = jax.nn.sigmoid(y)
    o_ref[...] = y.astype(o_ref.dtype)


def _stage_kernel(skip_ref, aup_ref, wskip_ref, b_ref, wnext_ref, o_ref):
    """Fused decoder stage: o = W_next @ relu(W_skip @ skip + a_up + b).

    Equivalent to the next stage's coarse conv applied to
    relu(conv1x1(concat([upsample(x), skip]))) because 1x1 conv is linear and the
    coarse-branch partial conv (a_up) was already applied.
    """
    y = jnp.dot(wskip_ref[...], skip_ref[...], preferred_element_type=jnp.float32)
    y = jnp.maximum(y + aup_ref[...].astype(jnp.float32) + b_ref[...], 0.0)
    o = jnp.dot(wnext_ref[...], y.astype(jnp.bfloat16),
                preferred_element_type=jnp.float32)
    o_ref[...] = o.astype(o_ref.dtype)


def _tail_kernel(skip_ref, aup_ref, wskip_ref, b_ref,
                 wft_ref, bft_ref, wfg_ref, bfg_ref,
                 w1f_ref, w1t_ref, w1g_ref, b1_ref, w2_ref, b2_ref, o_ref):
    """Last merged decoder stage + temporal/global final convs + mixing module, fused.

    o = sigmoid(W2 @ relu(W1f@skip + W1t@t + W1g*g + b1) + b2), where
    y = relu(W_skip@skip + a_up + b), t = Wft@y + bft, g = Wfg@y + bfg.
    The 6-channel temporal/global features never leave VMEM/vregs.
    """
    skip = skip_ref[...]
    y = jnp.dot(wskip_ref[...], skip, preferred_element_type=jnp.float32)
    y = jnp.maximum(y + aup_ref[...].astype(jnp.float32) + b_ref[...], 0.0)
    y16 = y.astype(jnp.bfloat16)
    t = jnp.dot(wft_ref[...], y16, preferred_element_type=jnp.float32) + bft_ref[...]
    g = jnp.dot(wfg_ref[...], y16, preferred_element_type=jnp.float32) + bfg_ref[...]
    h = jnp.dot(w1f_ref[...], skip, preferred_element_type=jnp.float32)
    h = h + jnp.dot(w1t_ref[...], t.astype(jnp.bfloat16),
                    preferred_element_type=jnp.float32)
    h = h + w1g_ref[...] * g                       # (hid,1)*(1,TM): K=1 as broadcast FMA
    h = jnp.maximum(h + b1_ref[...], 0.0)
    out = jnp.dot(w2_ref[...], h.astype(jnp.bfloat16),
                  preferred_element_type=jnp.float32)
    o_ref[...] = jax.nn.sigmoid(out + b2_ref[...])


def _norm_kernel(x_ref, o_ref, *, eps):
    """Per-row normalization by the spatial max (rows = batch, lanes = H*W)."""
    x = x_ref[...].astype(jnp.float32)
    m = jnp.max(x, axis=-1, keepdims=True)
    o_ref[...] = x / (m + eps)


# ----------------------------------------------------------------------------
# Tiling helpers
# ----------------------------------------------------------------------------
def _tile_m(m, tm_max=TM_MAX, target_blocks=4):
    """Multiple of 128 dividing m, sized for >= target_blocks grid steps when possible."""
    if m % 128 != 0 or m <= 128:
        return m
    divs = [t for t in range(128, min(m, tm_max) + 1, 128) if m % t == 0]
    if not divs:
        return m
    want = min(target_blocks, m // 128)
    good = [t for t in divs if m // t >= want]
    return max(good) if good else max(divs)


def _tile_rows(r, tr_max=256):
    if r % 8 != 0:
        return r
    tr = min(r, tr_max)
    while r % tr:
        tr -= 8
    return tr


def _flatten_pad(x, dtype=jnp.bfloat16):
    """(C, N, H, W) -> (C, M_padded) with M padded to a multiple of 128 when large."""
    c = x.shape[0]
    x2 = x.reshape(c, -1).astype(dtype)
    m = x2.shape[1]
    pad = ((-m) % 128) if m > 128 else 0
    if pad:
        x2 = jnp.pad(x2, ((0, 0), (0, pad)))
    return x2, m


# ----------------------------------------------------------------------------
# Pallas wrappers
# ----------------------------------------------------------------------------
def conv1x1_cf(x, w, b, act="none"):
    """1x1 convolution on channel-first input x: (Cin, N, H, W) -> (Cout, N, H, W)."""
    cin = x.shape[0]
    spatial = x.shape[1:]
    x2, m = _flatten_pad(x)
    mp = x2.shape[1]
    cout = w.shape[0]
    tm = _tile_m(mp)
    y = pl.pallas_call(
        functools.partial(_conv_kernel, act=act),
        out_shape=jax.ShapeDtypeStruct((cout, mp), jnp.bfloat16),
        grid=(mp // tm,),
        in_specs=[
            pl.BlockSpec((cin, tm), lambda i: (0, i)),
            pl.BlockSpec((cout, cin), lambda i: (0, 0)),   # grid-invariant weights
            pl.BlockSpec((cout, 1), lambda i: (0, 0)),
        ],
        out_specs=pl.BlockSpec((cout, tm), lambda i: (0, i)),
        compiler_params=_PARALLEL,
    )(x2, w.astype(jnp.bfloat16), b.astype(jnp.float32))
    return y[:, :m].reshape((cout,) + spatial)


def decoder_stage(skip, a_up, stage_p, w_next):
    """Fused merged-decoder stage; returns the NEXT stage's coarse branch (pre-upsample)."""
    c_skip = skip.shape[0]
    c_hid = stage_p["w_skip"].shape[0]
    c_out = w_next.shape[0]
    spatial = skip.shape[1:]
    s2, m = _flatten_pad(skip)
    a2, _ = _flatten_pad(a_up)
    mp = s2.shape[1]
    tm = _tile_m(mp)
    y = pl.pallas_call(
        _stage_kernel,
        out_shape=jax.ShapeDtypeStruct((c_out, mp), jnp.bfloat16),
        grid=(mp // tm,),
        in_specs=[
            pl.BlockSpec((c_skip, tm), lambda i: (0, i)),
            pl.BlockSpec((c_hid, tm), lambda i: (0, i)),
            pl.BlockSpec((c_hid, c_skip), lambda i: (0, 0)),
            pl.BlockSpec((c_hid, 1), lambda i: (0, 0)),
            pl.BlockSpec((c_out, c_hid), lambda i: (0, 0)),
        ],
        out_specs=pl.BlockSpec((c_out, tm), lambda i: (0, i)),
        compiler_params=_PARALLEL,
    )(s2, a2, stage_p["w_skip"].astype(jnp.bfloat16),
      stage_p["b"].astype(jnp.float32), w_next.astype(jnp.bfloat16))
    return y[:, :m].reshape((c_out,) + spatial)


def decoder_tail(skip, a_up, stage_p, final_t, final_g, mix):
    """Last merged stage + final convs + spatio-temporal mixing; returns (1, N, H, W) f32."""
    c_skip = skip.shape[0]
    c_hid = stage_p["w_skip"].shape[0]
    seq = final_t["w"].shape[0]
    hid_mix = mix["w1f"].shape[0]
    spatial = skip.shape[1:]
    s2, m = _flatten_pad(skip)
    a2, _ = _flatten_pad(a_up)
    mp = s2.shape[1]
    tm = _tile_m(mp)
    y = pl.pallas_call(
        _tail_kernel,
        out_shape=jax.ShapeDtypeStruct((1, mp), jnp.float32),
        grid=(mp // tm,),
        in_specs=[
            pl.BlockSpec((c_skip, tm), lambda i: (0, i)),
            pl.BlockSpec((c_hid, tm), lambda i: (0, i)),
            pl.BlockSpec((c_hid, c_skip), lambda i: (0, 0)),
            pl.BlockSpec((c_hid, 1), lambda i: (0, 0)),
            pl.BlockSpec((seq, c_hid), lambda i: (0, 0)),
            pl.BlockSpec((seq, 1), lambda i: (0, 0)),
            pl.BlockSpec((1, c_hid), lambda i: (0, 0)),
            pl.BlockSpec((1, 1), lambda i: (0, 0)),
            pl.BlockSpec((hid_mix, c_skip), lambda i: (0, 0)),
            pl.BlockSpec((hid_mix, seq), lambda i: (0, 0)),
            pl.BlockSpec((hid_mix, 1), lambda i: (0, 0)),
            pl.BlockSpec((hid_mix, 1), lambda i: (0, 0)),
            pl.BlockSpec((1, hid_mix), lambda i: (0, 0)),
            pl.BlockSpec((1, 1), lambda i: (0, 0)),
        ],
        out_specs=pl.BlockSpec((1, tm), lambda i: (0, i)),
        compiler_params=_PARALLEL,
    )(s2, a2,
      stage_p["w_skip"].astype(jnp.bfloat16), stage_p["b"].astype(jnp.float32),
      final_t["w"].astype(jnp.bfloat16), final_t["b"].astype(jnp.float32),
      final_g["w"].astype(jnp.bfloat16), final_g["b"].astype(jnp.float32),
      mix["w1f"].astype(jnp.bfloat16), mix["w1t"].astype(jnp.bfloat16),
      mix["w1g"].astype(jnp.float32), mix["b1"].astype(jnp.float32),
      mix["w2"].astype(jnp.bfloat16), mix["b2"].astype(jnp.float32))
    return y[:, :m].reshape((1,) + spatial)


def spatial_normalize_rows(x2, eps=EPS):
    """x / (max over last axis + eps); rows = batch, lanes = H*W."""
    r, s = x2.shape
    tr = _tile_rows(r)
    return pl.pallas_call(
        functools.partial(_norm_kernel, eps=eps),
        out_shape=jax.ShapeDtypeStruct((r, s), jnp.float32),
        grid=(r // tr,),
        in_specs=[pl.BlockSpec((tr, s), lambda i: (i, 0))],
        out_specs=pl.BlockSpec((tr, s), lambda i: (i, 0)),
        compiler_params=_PARALLEL,
    )(x2.astype(jnp.float32))


# ----------------------------------------------------------------------------
# Model glue (plain JAX, channel-first): pooling, upsampling, parameter setup
# ----------------------------------------------------------------------------
def avg_pool2x2_cf(x):
    # TODO(synk): could be fused into the following conv kernel; kept in XLA (cheap,
    # small quarter-resolution tensors, bf16).
    c, n, h, w = x.shape
    return x.reshape(c, n, h // 2, 2, w // 2, 2).mean(axis=(3, 5))


def upsample2x_cf(x):
    # TODO(synk): nearest 2x upsample of the small coarse decoder branch kept in XLA;
    # an in-kernel lane/sublane doubling would save one more HBM round trip per stage.
    return jnp.repeat(jnp.repeat(x, 2, axis=2), 2, axis=3)


def _mk_w(key, cout, cin, fan_in=None):
    fan_in = cin if fan_in is None else fan_in
    return jax.random.normal(key, (cout, cin), jnp.float32) / jnp.sqrt(fan_in)


def _block_diag(a, b):
    za = jnp.zeros((a.shape[0], b.shape[1]), a.dtype)
    zb = jnp.zeros((b.shape[0], a.shape[1]), a.dtype)
    return jnp.concatenate(
        [jnp.concatenate([a, za], axis=1), jnp.concatenate([zb, b], axis=1)], axis=0)


def init_params(key, eps=EPS):
    keys = iter(jax.random.split(key, 64))
    params = {}

    # Encoder: pool -> 1x1 conv -> relu per scale.  Input normalization
    # ((x - 0.5) / (0.5 + eps)) folded exactly into the first conv's weights/bias.
    enc, cin = [], 3
    for li, c in enumerate(FEATURE_CHANNELS):
        w = _mk_w(next(keys), c, cin)
        b = jnp.zeros((c, 1), jnp.float32)
        if li == 0:
            scale = 1.0 / (0.5 + eps)
            b = b - (0.5 * scale) * jnp.sum(w, axis=1, keepdims=True)
            w = w * scale
        enc.append({"w": w.astype(jnp.bfloat16), "b": b})
        cin = c
    params["encoder"] = enc

    # Temporal (out=SEQ) and global (out=1) decoders, merged along Cout
    # (stacked w_skip, block-diagonal w_x/final) => single decoder pass, same math.
    def one_decoder(out_ch):
        layers, cur = [], FEATURE_CHANNELS[-1]
        for skip_c, hid in zip(FEATURE_CHANNELS[-2::-1], HIDDEN_CHANNELS):
            fan_in = cur + skip_c
            layers.append({
                "w_x": _mk_w(next(keys), hid, cur, fan_in),
                "w_skip": _mk_w(next(keys), hid, skip_c, fan_in),
                "b": jnp.zeros((hid, 1), jnp.float32),
            })
            cur = hid
        final = {"w": _mk_w(next(keys), out_ch, cur),
                 "b": jnp.zeros((out_ch, 1), jnp.float32)}
        return layers, final

    t_layers, t_final = one_decoder(SEQUENCE_LENGTH)
    g_layers, g_final = one_decoder(1)
    stages = []
    for si, (tl, gl) in enumerate(zip(t_layers, g_layers)):
        w_x = (jnp.concatenate([tl["w_x"], gl["w_x"]], axis=0) if si == 0
               else _block_diag(tl["w_x"], gl["w_x"]))
        stages.append({
            "w_x": w_x.astype(jnp.bfloat16),
            "w_skip": jnp.concatenate([tl["w_skip"], gl["w_skip"]],
                                      axis=0).astype(jnp.bfloat16),
            "b": jnp.concatenate([tl["b"], gl["b"]], axis=0),
        })
    hid_last = HIDDEN_CHANNELS[-1]
    params["decoder"] = {
        "stages": stages,
        "final_t": {
            "w": jnp.concatenate(
                [t_final["w"], jnp.zeros((SEQUENCE_LENGTH, hid_last), jnp.float32)],
                axis=1).astype(jnp.bfloat16),
            "b": t_final["b"]},
        "final_g": {
            "w": jnp.concatenate(
                [jnp.zeros((1, hid_last), jnp.float32), g_final["w"]],
                axis=1).astype(jnp.bfloat16),
            "b": g_final["b"]},
    }

    # Spatio-temporal mixing module (concat -> conv/relu -> conv/sigmoid), fused.
    mix_in = FEATURE_CHANNELS[0] + SEQUENCE_LENGTH + 1
    hid = HIDDEN_CHANNELS[-1]
    params["mix"] = {
        "w1f": _mk_w(next(keys), hid, FEATURE_CHANNELS[0], mix_in).astype(jnp.bfloat16),
        "w1t": _mk_w(next(keys), hid, SEQUENCE_LENGTH, mix_in).astype(jnp.bfloat16),
        "w1g": _mk_w(next(keys), hid, 1, mix_in),
        "b1": jnp.zeros((hid, 1), jnp.float32),
        "w2": _mk_w(next(keys), 1, hid).astype(jnp.bfloat16),
        "b2": jnp.zeros((1, 1), jnp.float32),
    }
    return params


def tempsal_forward(x_nchw, params, eps=EPS):
    """TempSAL output_type='global' path: returns (None, global_output)."""
    n, _, h, w = x_nchw.shape

    # Input normalization is folded into the first encoder conv's weights; only the
    # 2x2 average pool + NCHW -> channel-first transpose touch the full-res image (XLA).
    xp = x_nchw.astype(jnp.float32).reshape(n, 3, h // 2, 2, w // 2, 2).mean(axis=(3, 5))
    x = jnp.transpose(xp, (1, 0, 2, 3)).astype(jnp.bfloat16)      # (3, N, H/2, W/2)

    # Shared image encoder: channel-first feature pyramid at /2, /4, /8, /16.
    feats = []
    for li, layer in enumerate(params["encoder"]):
        if li > 0:
            x = avg_pool2x2_cf(x)
        x = conv1x1_cf(x, layer["w"], layer["b"], act="relu")
        feats.append(x)

    # Merged temporal+global decoder (single pass over the shared skip features).
    # temporal_output (sigmoid+norm of the temporal maps) is unused on the 'global'
    # path and not computed.  Everything below /2 resolution stays at /2 because the
    # synthesized 1x1 convs / elementwise ops commute with nearest upsampling; the
    # final nearest upsample is deferred past the spatial normalization.
    dec = params["decoder"]
    st = dec["stages"]
    zero_b = jnp.zeros((st[0]["w_x"].shape[0], 1), jnp.float32)
    a = conv1x1_cf(feats[3], st[0]["w_x"], zero_b, act="none")             # /16, 64ch
    a = decoder_stage(feats[2], upsample2x_cf(a), st[0], st[1]["w_x"])     # /8,  32ch
    a = decoder_stage(feats[1], upsample2x_cf(a), st[1], st[2]["w_x"])     # /4,  16ch
    mixed_half = decoder_tail(feats[0], upsample2x_cf(a), st[2],
                              dec["final_t"], dec["final_g"], params["mix"])  # /2, 1ch

    # Spatial max-normalization at /2 res (nearest upsample preserves the max), then
    # the final 2x nearest upsample on the tiny single-channel normalized map.
    half = mixed_half[0].reshape(n, (h // 2) * (w // 2))
    normed = spatial_normalize_rows(half, eps).reshape(n, h // 2, w // 2)
    global_output = jnp.repeat(jnp.repeat(normed, 2, axis=1), 2, axis=2)
    return None, global_output


if __name__ == "__main__":
    key = jax.random.PRNGKey(0)
    k_x, k_p = jax.random.split(key)
    x = jax.random.uniform(k_x, (2, 3, 32, 32), dtype=jnp.float32)  # NCHW image in [0, 1]
    params = init_params(k_p)

    fwd = jax.jit(functools.partial(tempsal_forward, params=params))
    _, global_out = fwd(x)
    jax.block_until_ready(global_out)
    assert global_out.shape == (2, 32, 32)
    assert bool(jnp.all(jnp.isfinite(global_out)))
    print("KERNEL_OK")
</pallas_src>

<mosaic_0001>
module attributes {stable_mosaic.version = 11 : i64} {
  func.func @_conv_kernel(%arg0: i32, %arg1: memref<3x128xbf16, #tpu.memory_space<vmem>>, %arg2: memref<8x3xbf16, #tpu.memory_space<vmem>>, %arg3: memref<8x1xf32, #tpu.memory_space<vmem>>, %arg4: memref<8x128xbf16, #tpu.memory_space<vmem>>) attributes {dimension_semantics = [#tpu.dimension_semantics<parallel>], iteration_bounds = array<i64: 4>, scalar_prefetch = 0 : i64, scratch_operands = 0 : i64, tpu.core_type = #tpu.core_type<tc>, window_params = [{transform_indices = @transform_0, window_bounds = array<i64: 3, 128>}, {pipeline_mode = #tpu.pipeline_mode<synchronous>, transform_indices = @transform_1, window_bounds = array<i64: 8, 3>}, {pipeline_mode = #tpu.pipeline_mode<synchronous>, transform_indices = @transform_2, window_bounds = array<i64: 8, 1>}, {transform_indices = @transform_3, window_bounds = array<i64: 8, 128>}]} {
    %c0 = arith.constant 0 : index
    %c0_0 = arith.constant 0 : index
    %0 = vector.load %arg1[%c0, %c0_0] : memref<3x128xbf16, #tpu.memory_space<vmem>>, vector<3x128xbf16>
    %1 = arith.extf %0 : vector<3x128xbf16> to vector<3x128xf32>
    %c0_1 = arith.constant 0 : index
    %c0_2 = arith.constant 0 : index
    %2 = vector.load %arg2[%c0_1, %c0_2] : memref<8x3xbf16, #tpu.memory_space<vmem>>, vector<8x3xbf16>
    %3 = arith.extf %2 : vector<8x3xbf16> to vector<8x3xf32>
    %c0_3 = arith.constant 0 : index
    %c0_4 = arith.constant 0 : index
    %4 = vector.load %arg3[%c0_3, %c0_4] : memref<8x1xf32, #tpu.memory_space<vmem>>, vector<8x1xf32>
    %5 = vector.extract_strided_slice %3 {offsets = [0, 0], sizes = [8, 1], strides = [1, 1]} : vector<8x3xf32> to vector<8x1xf32>
    %6 = vector.extract_strided_slice %1 {offsets = [0, 0], sizes = [1, 128], strides = [1, 1]} : vector<3x128xf32> to vector<1x128xf32>
    %7 = vector.broadcast %5 : vector<8x1xf32> to vector<8x128xf32>
    %8 = vector.broadcast %6 : vector<1x128xf32> to vector<8x128xf32>
    %9 = arith.mulf %7, %8 : vector<8x128xf32>
    %10 = vector.broadcast %4 : vector<8x1xf32> to vector<8x128xf32>
    %11 = arith.addf %10, %9 : vector<8x128xf32>
    %12 = vector.extract_strided_slice %3 {offsets = [0, 1], sizes = [8, 1], strides = [1, 1]} : vector<8x3xf32> to vector<8x1xf32>
    %13 = vector.extract_strided_slice %1 {offsets = [1, 0], sizes = [1, 128], strides = [1, 1]} : vector<3x128xf32> to vector<1x128xf32>
    %14 = vector.broadcast %12 : vector<8x1xf32> to vector<8x128xf32>
    %15 = vector.broadcast %13 : vector<1x128xf32> to vector<8x128xf32>
    %16 = arith.mulf %14, %15 : vector<8x128xf32>
    %17 = arith.addf %11, %16 : vector<8x128xf32>
    %18 = vector.extract_strided_slice %3 {offsets = [0, 2], sizes = [8, 1], strides = [1, 1]} : vector<8x3xf32> to vector<8x1xf32>
    %19 = vector.extract_strided_slice %1 {offsets = [2, 0], sizes = [1, 128], strides = [1, 1]} : vector<3x128xf32> to vector<1x128xf32>
    %20 = vector.broadcast %18 : vector<8x1xf32> to vector<8x128xf32>
    %21 = vector.broadcast %19 : vector<1x128xf32> to vector<8x128xf32>
    %22 = arith.mulf %20, %21 : vector<8x128xf32>
    %23 = arith.addf %17, %22 : vector<8x128xf32>
    %cst = arith.constant 0.000000e+00 : f32
    %24 = vector.broadcast %cst : f32 to vector<8x128xf32>
    %25 = arith.maximumf %23, %24 : vector<8x128xf32>
    %26 = arith.truncf %25 : vector<8x128xf32> to vector<8x128xbf16>
    %c0_5 = arith.constant 0 : index
    %c0_6 = arith.constant 0 : index
    %27 = vector.load %arg4[%c0_5, %c0_6] : memref<8x128xbf16, #tpu.memory_space<vmem>>, vector<8x128xbf16>
    tpu.vector_store %arg4[%c0_5, %c0_6], %26 {strides = array<i32>} : memref<8x128xbf16, #tpu.memory_space<vmem>>, vector<8x128xbf16>,
    return
  }
  func.func @transform_0(%arg0: i32) -> (i32, i32) {
    %c0_i32 = arith.constant 0 : i32
    %c0_i32_0 = arith.constant 0 : i32
    return %c0_i32, %arg0 : i32, i32
  }
  func.func @transform_1(%arg0: i32) -> (i32, i32) {
    %c0_i32 = arith.constant 0 : i32
    %c0_i32_0 = arith.constant 0 : i32
    %c0_i32_1 = arith.constant 0 : i32
    return %c0_i32, %c0_i32_0 : i32, i32
  }
  func.func @transform_2(%arg0: i32) -> (i32, i32) {
    %c0_i32 = arith.constant 0 : i32
    %c0_i32_0 = arith.constant 0 : i32
    %c0_i32_1 = arith.constant 0 : i32
    return %c0_i32, %c0_i32_0 : i32, i32
  }
  func.func @transform_3(%arg0: i32) -> (i32, i32) {
    %c0_i32 = arith.constant 0 : i32
    %c0_i32_0 = arith.constant 0 : i32
    return %c0_i32, %arg0 : i32, i32
  }
}

module attributes {stable_mosaic.version = 11 : i64} {
  func.func @_conv_kernel(%arg0: i32, %arg1: memref<8x128xbf16, #tpu.memory_space<vmem>>, %arg2: memref<16x8xbf16, #tpu.memory_space<vmem>>, %arg3: memref<16x1xf32, #tpu.memory_space<vmem>>, %arg4: memref<16x128xbf16, #tpu.memory_space<vmem>>) attributes {dimension_semantics = [#tpu.dimension_semantics<parallel>], iteration_bounds = array<i64: 1>, scalar_prefetch = 0 : i64, scratch_operands = 0 : i64, tpu.core_type = #tpu.core_type<tc>, window_params = [{transform_indices = @transform_0, window_bounds = array<i64: 8, 128>}, {pipeline_mode = #tpu.pipeline_mode<synchronous>, transform_indices = @transform_1, window_bounds = array<i64: 16, 8>}, {pipeline_mode = #tpu.pipeline_mode<synchronous>, transform_indices = @transform_2, window_bounds = array<i64: 16, 1>}, {transform_indices = @transform_3, window_bounds = array<i64: 16, 128>}]} {
    %c0 = arith.constant 0 : index
    %c0_0 = arith.constant 0 : index
    %0 = vector.load %arg2[%c0, %c0_0] : memref<16x8xbf16, #tpu.memory_space<vmem>>, vector<16x8xbf16>
    %c0_1 = arith.constant 0 : index
    %c0_2 = arith.constant 0 : index
    %1 = vector.load %arg1[%c0_1, %c0_2] : memref<8x128xbf16, #tpu.memory_space<vmem>>, vector<8x128xbf16>
    %cst = arith.constant dense<0.000000e+00> : vector<16x128xf32>
    %2 = tpu.matmul %0, %1, %cst {dimension_numbers = #tpu.dot_dimension_numbers<[1], [0], [0], [1], [0, 0, 1, 1], [], []>} : vector<16x8xbf16>, vector<8x128xbf16>, vector<16x128xf32> -> vector<16x128xf32>
    %c0_3 = arith.constant 0 : index
    %c0_4 = arith.constant 0 : index
    %3 = vector.load %arg3[%c0_3, %c0_4] : memref<16x1xf32, #tpu.memory_space<vmem>>, vector<16x1xf32>
    %4 = vector.broadcast %3 : vector<16x1xf32> to vector<16x128xf32>
    %5 = arith.addf %2, %4 : vector<16x128xf32>
    %cst_5 = arith.constant 0.000000e+00 : f32
    %6 = vector.broadcast %cst_5 : f32 to vector<16x128xf32>
    %7 = arith.maximumf %5, %6 : vector<16x128xf32>
    %8 = arith.truncf %7 : vector<16x128xf32> to vector<16x128xbf16>
    %c0_6 = arith.constant 0 : index
    %c0_7 = arith.constant 0 : index
    %9 = vector.load %arg4[%c0_6, %c0_7] : memref<16x128xbf16, #tpu.memory_space<vmem>>, vector<16x128xbf16>
    tpu.vector_store %arg4[%c0_6, %c0_7], %8 {strides = array<i32>} : memref<16x128xbf16, #tpu.memory_space<vmem>>, vector<16x128xbf16>,
    return
  }
  func.func @transform_0(%arg0: i32) -> (i32, i32) {
    %c0_i32 = arith.constant 0 : i32
    %c0_i32_0 = arith.constant 0 : i32
    return %c0_i32, %arg0 : i32, i32
  }
  func.func @transform_1(%arg0: i32) -> (i32, i32) {
    %c0_i32 = arith.constant 0 : i32
    %c0_i32_0 = arith.constant 0 : i32
    %c0_i32_1 = arith.constant 0 : i32
    return %c0_i32, %c0_i32_0 : i32, i32
  }
  func.func @transform_2(%arg0: i32) -> (i32, i32) {
    %c0_i32 = arith.constant 0 : i32
    %c0_i32_0 = arith.constant 0 : i32
    %c0_i32_1 = arith.constant 0 : i32
    return %c0_i32, %c0_i32_0 : i32, i32
  }
  func.func @transform_3(%arg0: i32) -> (i32, i32) {
    %c0_i32 = arith.constant 0 : i32
    %c0_i32_0 = arith.constant 0 : i32
    return %c0_i32, %arg0 : i32, i32
  }
}

module attributes {stable_mosaic.version = 11 : i64} {
  func.func @_conv_kernel(%arg0: i32, %arg1: memref<16x32xbf16, #tpu.memory_space<vmem>>, %arg2: memref<32x16xbf16, #tpu.memory_space<vmem>>, %arg3: memref<32x1xf32, #tpu.memory_space<vmem>>, %arg4: memref<32x32xbf16, #tpu.memory_space<vmem>>) attributes {dimension_semantics = [#tpu.dimension_semantics<parallel>], iteration_bounds = array<i64: 1>, scalar_prefetch = 0 : i64, scratch_operands = 0 : i64, tpu.core_type = #tpu.core_type<tc>, window_params = [{transform_indices = @transform_0, window_bounds = array<i64: 16, 32>}, {pipeline_mode = #tpu.pipeline_mode<synchronous>, transform_indices = @transform_1, window_bounds = array<i64: 32, 16>}, {pipeline_mode = #tpu.pipeline_mode<synchronous>, transform_indices = @transform_2, window_bounds = array<i64: 32, 1>}, {transform_indices = @transform_3, window_bounds = array<i64: 32, 32>}]} {
    %c0 = arith.constant 0 : index
    %c0_0 = arith.constant 0 : index
    %0 = vector.load %arg2[%c0, %c0_0] : memref<32x16xbf16, #tpu.memory_space<vmem>>, vector<32x16xbf16>
    %c0_1 = arith.constant 0 : index
    %c0_2 = arith.constant 0 : index
    %1 = vector.load %arg1[%c0_1, %c0_2] : memref<16x32xbf16, #tpu.memory_space<vmem>>, vector<16x32xbf16>
    %cst = arith.constant dense<0.000000e+00> : vector<32x32xf32>
    %2 = tpu.matmul %0, %1, %cst {dimension_numbers = #tpu.dot_dimension_numbers<[1], [0], [0], [1], [0, 0, 1, 1], [], []>} : vector<32x16xbf16>, vector<16x32xbf16>, vector<32x32xf32> -> vector<32x32xf32>
    %c0_3 = arith.constant 0 : index
    %c0_4 = arith.constant 0 : index
    %3 = vector.load %arg3[%c0_3, %c0_4] : memref<32x1xf32, #tpu.memory_space<vmem>>, vector<32x1xf32>
    %4 = vector.broadcast %3 : vector<32x1xf32> to vector<32x32xf32>
    %5 = arith.addf %2, %4 : vector<32x32xf32>
    %cst_5 = arith.constant 0.000000e+00 : f32
    %6 = vector.broadcast %cst_5 : f32 to vector<32x32xf32>
    %7 = arith.maximumf %5, %6 : vector<32x32xf32>
    %8 = arith.truncf %7 : vector<32x32xf32> to vector<32x32xbf16>
    %c0_6 = arith.constant 0 : index
    %c0_7 = arith.constant 0 : index
    %9 = vector.load %arg4[%c0_6, %c0_7] : memref<32x32xbf16, #tpu.memory_space<vmem>>, vector<32x32xbf16>
    tpu.vector_store %arg4[%c0_6, %c0_7], %8 {strides = array<i32>} : memref<32x32xbf16, #tpu.memory_space<vmem>>, vector<32x32xbf16>,
    return
  }
  func.func @transform_0(%arg0: i32) -> (i32, i32) {
    %c0_i32 = arith.constant 0 : i32
    %c0_i32_0 = arith.constant 0 : i32
    return %c0_i32, %arg0 : i32, i32
  }
  func.func @transform_1(%arg0: i32) -> (i32, i32) {
    %c0_i32 = arith.constant 0 : i32
    %c0_i32_0 = arith.constant 0 : i32
    %c0_i32_1 = arith.constant 0 : i32
    return %c0_i32, %c0_i32_0 : i32, i32
  }
  func.func @transform_2(%arg0: i32) -> (i32, i32) {
    %c0_i32 = arith.constant 0 : i32
    %c0_i32_0 = arith.constant 0 : i32
    %c0_i32_1 = arith.constant 0 : i32
    return %c0_i32, %c0_i32_0 : i32, i32
  }
  func.func @transform_3(%arg0: i32) -> (i32, i32) {
    %c0_i32 = arith.constant 0 : i32
    %c0_i32_0 = arith.constant 0 : i32
    return %c0_i32, %arg0 : i32, i32
  }
}

module attributes {stable_mosaic.version = 11 : i64} {
  func.func @_conv_kernel(%arg0: i32, %arg1: memref<32x8xbf16, #tpu.memory_space<vmem>>, %arg2: memref<32x32xbf16, #tpu.memory_space<vmem>>, %arg3: memref<32x1xf32, #tpu.memory_space<vmem>>, %arg4: memref<32x8xbf16, #tpu.memory_space<vmem>>) attributes {dimension_semantics = [#tpu.dimension_semantics<parallel>], iteration_bounds = array<i64: 1>, scalar_prefetch = 0 : i64, scratch_operands = 0 : i64, tpu.core_type = #tpu.core_type<tc>, window_params = [{transform_indices = @transform_0, window_bounds = array<i64: 32, 8>}, {pipeline_mode = #tpu.pipeline_mode<synchronous>, transform_indices = @transform_1, window_bounds = array<i64: 32, 32>}, {pipeline_mode = #tpu.pipeline_mode<synchronous>, transform_indices = @transform_2, window_bounds = array<i64: 32, 1>}, {transform_indices = @transform_3, window_bounds = array<i64: 32, 8>}]} {
    %c0 = arith.constant 0 : index
    %c0_0 = arith.constant 0 : index
    %0 = vector.load %arg2[%c0, %c0_0] : memref<32x32xbf16, #tpu.memory_space<vmem>>, vector<32x32xbf16>
    %c0_1 = arith.constant 0 : index
    %c0_2 = arith.constant 0 : index
    %1 = vector.load %arg1[%c0_1, %c0_2] : memref<32x8xbf16, #tpu.memory_space<vmem>>, vector<32x8xbf16>
    %cst = arith.constant dense<0.000000e+00> : vector<32x8xf32>
    %2 = tpu.matmul %0, %1, %cst {dimension_numbers = #tpu.dot_dimension_numbers<[1], [0], [0], [1], [0, 0, 1, 1], [], []>} : vector<32x32xbf16>, vector<32x8xbf16>, vector<32x8xf32> -> vector<32x8xf32>
    %c0_3 = arith.constant 0 : index
    %c0_4 = arith.constant 0 : index
    %3 = vector.load %arg3[%c0_3, %c0_4] : memref<32x1xf32, #tpu.memory_space<vmem>>, vector<32x1xf32>
    %4 = vector.broadcast %3 : vector<32x1xf32> to vector<32x8xf32>
    %5 = arith.addf %2, %4 : vector<32x8xf32>
    %cst_5 = arith.constant 0.000000e+00 : f32
    %6 = vector.broadcast %cst_5 : f32 to vector<32x8xf32>
    %7 = arith.maximumf %5, %6 : vector<32x8xf32>
    %8 = arith.truncf %7 : vector<32x8xf32> to vector<32x8xbf16>
    %c0_6 = arith.constant 0 : index
    %c0_7 = arith.constant 0 : index
    %9 = vector.load %arg4[%c0_6, %c0_7] : memref<32x8xbf16, #tpu.memory_space<vmem>>, vector<32x8xbf16>
    tpu.vector_store %arg4[%c0_6, %c0_7], %8 {strides = array<i32>} : memref<32x8xbf16, #tpu.memory_space<vmem>>, vector<32x8xbf16>,
    return
  }
  func.func @transform_0(%arg0: i32) -> (i32, i32) {
    %c0_i32 = arith.constant 0 : i32
    %c0_i32_0 = arith.constant 0 : i32
    return %c0_i32, %arg0 : i32, i32
  }
  func.func @transform_1(%arg0: i32) -> (i32, i32) {
    %c0_i32 = arith.constant 0 : i32
    %c0_i32_0 = arith.constant 0 : i32
    %c0_i32_1 = arith.constant 0 : i32
    return %c0_i32, %c0_i32_0 : i32, i32
  }
  func.func @transform_2(%arg0: i32) -> (i32, i32) {
    %c0_i32 = arith.constant 0 : i32
    %c0_i32_0 = arith.constant 0 : i32
    %c0_i32_1 = arith.constant 0 : i32
    return %c0_i32, %c0_i32_0 : i32, i32
  }
  func.func @transform_3(%arg0: i32) -> (i32, i32) {
    %c0_i32 = arith.constant 0 : i32
    %c0_i32_0 = arith.constant 0 : i32
    return %c0_i32, %arg0 : i32, i32
  }
}

module attributes {stable_mosaic.version = 11 : i64} {
  func.func @_conv_kernel(%arg0: i32, %arg1: memref<32x8xbf16, #tpu.memory_space<vmem>>, %arg2: memref<64x32xbf16, #tpu.memory_space<vmem>>, %arg3: memref<64x1xf32, #tpu.memory_space<vmem>>, %arg4: memref<64x8xbf16, #tpu.memory_space<vmem>>) attributes {dimension_semantics = [#tpu.dimension_semantics<parallel>], iteration_bounds = array<i64: 1>, scalar_prefetch = 0 : i64, scratch_operands = 0 : i64, tpu.core_type = #tpu.core_type<tc>, window_params = [{transform_indices = @transform_0, window_bounds = array<i64: 32, 8>}, {pipeline_mode = #tpu.pipeline_mode<synchronous>, transform_indices = @transform_1, window_bounds = array<i64: 64, 32>}, {pipeline_mode = #tpu.pipeline_mode<synchronous>, transform_indices = @transform_2, window_bounds = array<i64: 64, 1>}, {transform_indices = @transform_3, window_bounds = array<i64: 64, 8>}]} {
    %c0 = arith.constant 0 : index
    %c0_0 = arith.constant 0 : index
    %0 = vector.load %arg2[%c0, %c0_0] : memref<64x32xbf16, #tpu.memory_space<vmem>>, vector<64x32xbf16>
    %c0_1 = arith.constant 0 : index
    %c0_2 = arith.constant 0 : index
    %1 = vector.load %arg1[%c0_1, %c0_2] : memref<32x8xbf16, #tpu.memory_space<vmem>>, vector<32x8xbf16>
    %cst = arith.constant dense<0.000000e+00> : vector<64x8xf32>
    %2 = tpu.matmul %0, %1, %cst {dimension_numbers = #tpu.dot_dimension_numbers<[1], [0], [0], [1], [0, 0, 1, 1], [], []>} : vector<64x32xbf16>, vector<32x8xbf16>, vector<64x8xf32> -> vector<64x8xf32>
    %c0_3 = arith.constant 0 : index
    %c0_4 = arith.constant 0 : index
    %3 = vector.load %arg3[%c0_3, %c0_4] : memref<64x1xf32, #tpu.memory_space<vmem>>, vector<64x1xf32>
    %4 = vector.broadcast %3 : vector<64x1xf32> to vector<64x8xf32>
    %5 = arith.addf %2, %4 : vector<64x8xf32>
    %6 = arith.truncf %5 : vector<64x8xf32> to vector<64x8xbf16>
    %c0_5 = arith.constant 0 : index
    %c0_6 = arith.constant 0 : index
    %7 = vector.load %arg4[%c0_5, %c0_6] : memref<64x8xbf16, #tpu.memory_space<vmem>>, vector<64x8xbf16>
    tpu.vector_store %arg4[%c0_5, %c0_6], %6 {strides = array<i32>} : memref<64x8xbf16, #tpu.memory_space<vmem>>, vector<64x8xbf16>,
    return
  }
  func.func @transform_0(%arg0: i32) -> (i32, i32) {
    %c0_i32 = arith.constant 0 : i32
    %c0_i32_0 = arith.constant 0 : i32
    return %c0_i32, %arg0 : i32, i32
  }
  func.func @transform_1(%arg0: i32) -> (i32, i32) {
    %c0_i32 = arith.constant 0 : i32
    %c0_i32_0 = arith.constant 0 : i32
    %c0_i32_1 = arith.constant 0 : i32
    return %c0_i32, %c0_i32_0 : i32, i32
  }
  func.func @transform_2(%arg0: i32) -> (i32, i32) {
    %c0_i32 = arith.constant 0 : i32
    %c0_i32_0 = arith.constant 0 : i32
    %c0_i32_1 = arith.constant 0 : i32
    return %c0_i32, %c0_i32_0 : i32, i32
  }
  func.func @transform_3(%arg0: i32) -> (i32, i32) {
    %c0_i32 = arith.constant 0 : i32
    %c0_i32_0 = arith.constant 0 : i32
    return %c0_i32, %arg0 : i32, i32
  }
}

module attributes {stable_mosaic.version = 11 : i64} {
  func.func @_stage_kernel(%arg0: i32, %arg1: memref<32x32xbf16, #tpu.memory_space<vmem>>, %arg2: memref<64x32xbf16, #tpu.memory_space<vmem>>, %arg3: memref<64x32xbf16, #tpu.memory_space<vmem>>, %arg4: memref<64x1xf32, #tpu.memory_space<vmem>>, %arg5: memref<32x64xbf16, #tpu.memory_space<vmem>>, %arg6: memref<32x32xbf16, #tpu.memory_space<vmem>>) attributes {dimension_semantics = [#tpu.dimension_semantics<parallel>], iteration_bounds = array<i64: 1>, scalar_prefetch = 0 : i64, scratch_operands = 0 : i64, tpu.core_type = #tpu.core_type<tc>, window_params = [{transform_indices = @transform_0, window_bounds = array<i64: 32, 32>}, {transform_indices = @transform_1, window_bounds = array<i64: 64, 32>}, {pipeline_mode = #tpu.pipeline_mode<synchronous>, transform_indices = @transform_2, window_bounds = array<i64: 64, 32>}, {pipeline_mode = #tpu.pipeline_mode<synchronous>, transform_indices = @transform_3, window_bounds = array<i64: 64, 1>}, {pipeline_mode = #tpu.pipeline_mode<synchronous>, transform_indices = @transform_4, window_bounds = array<i64: 32, 64>}, {transform_indices = @transform_5, window_bounds = array<i64: 32, 32>}]} {
    %c0 = arith.constant 0 : index
    %c0_0 = arith.constant 0 : index
    %0 = vector.load %arg3[%c0, %c0_0] : memref<64x32xbf16, #tpu.memory_space<vmem>>, vector<64x32xbf16>
    %c0_1 = arith.constant 0 : index
    %c0_2 = arith.constant 0 : index
    %1 = vector.load %arg1[%c0_1, %c0_2] : memref<32x32xbf16, #tpu.memory_space<vmem>>, vector<32x32xbf16>
    %cst = arith.constant dense<0.000000e+00> : vector<64x32xf32>
    %2 = tpu.matmul %0, %1, %cst {dimension_numbers = #tpu.dot_dimension_numbers<[1], [0], [0], [1], [0, 0, 1, 1], [], []>} : vector<64x32xbf16>, vector<32x32xbf16>, vector<64x32xf32> -> vector<64x32xf32>
    %c0_3 = arith.constant 0 : index
    %c0_4 = arith.constant 0 : index
    %3 = vector.load %arg2[%c0_3, %c0_4] : memref<64x32xbf16, #tpu.memory_space<vmem>>, vector<64x32xbf16>
    %4 = arith.extf %3 : vector<64x32xbf16> to vector<64x32xf32>
    %5 = arith.addf %2, %4 : vector<64x32xf32>
    %c0_5 = arith.constant 0 : index
    %c0_6 = arith.constant 0 : index
    %6 = vector.load %arg4[%c0_5, %c0_6] : memref<64x1xf32, #tpu.memory_space<vmem>>, vector<64x1xf32>
    %7 = vector.broadcast %6 : vector<64x1xf32> to vector<64x32xf32>
    %8 = arith.addf %5, %7 : vector<64x32xf32>
    %cst_7 = arith.constant 0.000000e+00 : f32
    %9 = vector.broadcast %cst_7 : f32 to vector<64x32xf32>
    %10 = arith.maximumf %8, %9 : vector<64x32xf32>
    %c0_8 = arith.constant 0 : index
    %c0_9 = arith.constant 0 : index
    %11 = vector.load %arg5[%c0_8, %c0_9] : memref<32x64xbf16, #tpu.memory_space<vmem>>, vector<32x64xbf16>
    %12 = arith.truncf %10 : vector<64x32xf32> to vector<64x32xbf16>
    %cst_10 = arith.constant dense<0.000000e+00> : vector<32x32xf32>
    %13 = tpu.matmul %11, %12, %cst_10 {dimension_numbers = #tpu.dot_dimension_numbers<[1], [0], [0], [1], [0, 0, 1, 1], [], []>} : vector<32x64xbf16>, vector<64x32xbf16>, vector<32x32xf32> -> vector<32x32xf32>
    %14 = arith.truncf %13 : vector<32x32xf32> to vector<32x32xbf16>
    %c0_11 = arith.constant 0 : index
    %c0_12 = arith.constant 0 : index
    %15 = vector.load %arg6[%c0_11, %c0_12] : memref<32x32xbf16, #tpu.memory_space<vmem>>, vector<32x32xbf16>
    tpu.vector_store %arg6[%c0_11, %c0_12], %14 {strides = array<i32>} : memref<32x32xbf16, #tpu.memory_space<vmem>>, vector<32x32xbf16>,
    return
  }
  func.func @transform_0(%arg0: i32) -> (i32, i32) {
    %c0_i32 = arith.constant 0 : i32
    %c0_i32_0 = arith.constant 0 : i32
    return %c0_i32, %arg0 : i32, i32
  }
  func.func @transform_1(%arg0: i32) -> (i32, i32) {
    %c0_i32 = arith.constant 0 : i32
    %c0_i32_0 = arith.constant 0 : i32
    return %c0_i32, %arg0 : i32, i32
  }
  func.func @transform_2(%arg0: i32) -> (i32, i32) {
    %c0_i32 = arith.constant 0 : i32
    %c0_i32_0 = arith.constant 0 : i32
    %c0_i32_1 = arith.constant 0 : i32
    return %c0_i32, %c0_i32_0 : i32, i32
  }
  func.func @transform_3(%arg0: i32) -> (i32, i32) {
    %c0_i32 = arith.constant 0 : i32
    %c0_i32_0 = arith.constant 0 : i32
    %c0_i32_1 = arith.constant 0 : i32
    return %c0_i32, %c0_i32_0 : i32, i32
  }
  func.func @transform_4(%arg0: i32) -> (i32, i32) {
    %c0_i32 = arith.constant 0 : i32
    %c0_i32_0 = arith.constant 0 : i32
    %c0_i32_1 = arith.constant 0 : i32
    return %c0_i32, %c0_i32_0 : i32, i32
  }
  func.func @transform_5(%arg0: i32) -> (i32, i32) {
    %c0_i32 = arith.constant 0 : i32
    %c0_i32_0 = arith.constant 0 : i32
    return %c0_i32, %arg0 : i32, i32
  }
}

module attributes {stable_mosaic.version = 11 : i64} {
  func.func @_stage_kernel(%arg0: i32, %arg1: memref<16x128xbf16, #tpu.memory_space<vmem>>, %arg2: memref<32x128xbf16, #tpu.memory_space<vmem>>, %arg3: memref<32x16xbf16, #tpu.memory_space<vmem>>, %arg4: memref<32x1xf32, #tpu.memory_space<vmem>>, %arg5: memref<16x32xbf16, #tpu.memory_space<vmem>>, %arg6: memref<16x128xbf16, #tpu.memory_space<vmem>>) attributes {dimension_semantics = [#tpu.dimension_semantics<parallel>], iteration_bounds = array<i64: 1>, scalar_prefetch = 0 : i64, scratch_operands = 0 : i64, tpu.core_type = #tpu.core_type<tc>, window_params = [{transform_indices = @transform_0, window_bounds = array<i64: 16, 128>}, {transform_indices = @transform_1, window_bounds = array<i64: 32, 128>}, {pipeline_mode = #tpu.pipeline_mode<synchronous>, transform_indices = @transform_2, window_bounds = array<i64: 32, 16>}, {pipeline_mode = #tpu.pipeline_mode<synchronous>, transform_indices = @transform_3, window_bounds = array<i64: 32, 1>}, {pipeline_mode = #tpu.pipeline_mode<synchronous>, transform_indices = @transform_4, window_bounds = array<i64: 16, 32>}, {transform_indices = @transform_5, window_bounds = array<i64: 16, 128>}]} {
    %c0 = arith.constant 0 : index
    %c0_0 = arith.constant 0 : index
    %0 = vector.load %arg3[%c0, %c0_0] : memref<32x16xbf16, #tpu.memory_space<vmem>>, vector<32x16xbf16>
    %c0_1 = arith.constant 0 : index
    %c0_2 = arith.constant 0 : index
    %1 = vector.load %arg1[%c0_1, %c0_2] : memref<16x128xbf16, #tpu.memory_space<vmem>>, vector<16x128xbf16>
    %cst = arith.constant dense<0.000000e+00> : vector<32x128xf32>
    %2 = tpu.matmul %0, %1, %cst {dimension_numbers = #tpu.dot_dimension_numbers<[1], [0], [0], [1], [0, 0, 1, 1], [], []>} : vector<32x16xbf16>, vector<16x128xbf16>, vector<32x128xf32> -> vector<32x128xf32>
    %c0_3 = arith.constant 0 : index
    %c0_4 = arith.constant 0 : index
    %3 = vector.load %arg2[%c0_3, %c0_4] : memref<32x128xbf16, #tpu.memory_space<vmem>>, vector<32x128xbf16>
    %4 = arith.extf %3 : vector<32x128xbf16> to vector<32x128xf32>
    %5 = arith.addf %2, %4 : vector<32x128xf32>
    %c0_5 = arith.constant 0 : index
    %c0_6 = arith.constant 0 : index
    %6 = vector.load %arg4[%c0_5, %c0_6] : memref<32x1xf32, #tpu.memory_space<vmem>>, vector<32x1xf32>
    %7 = vector.broadcast %6 : vector<32x1xf32> to vector<32x128xf32>
    %8 = arith.addf %5, %7 : vector<32x128xf32>
    %cst_7 = arith.constant 0.000000e+00 : f32
    %9 = vector.broadcast %cst_7 : f32 to vector<32x128xf32>
    %10 = arith.maximumf %8, %9 : vector<32x128xf32>
    %c0_8 = arith.constant 0 : index
    %c0_9 = arith.constant 0 : index
    %11 = vector.load %arg5[%c0_8, %c0_9] : memref<16x32xbf16, #tpu.memory_space<vmem>>, vector<16x32xbf16>
    %12 = arith.truncf %10 : vector<32x128xf32> to vector<32x128xbf16>
    %cst_10 = arith.constant dense<0.000000e+00> : vector<16x128xf32>
    %13 = tpu.matmul %11, %12, %cst_10 {dimension_numbers = #tpu.dot_dimension_numbers<[1], [0], [0], [1], [0, 0, 1, 1], [], []>} : vector<16x32xbf16>, vector<32x128xbf16>, vector<16x128xf32> -> vector<16x128xf32>
    %14 = arith.truncf %13 : vector<16x128xf32> to vector<16x128xbf16>
    %c0_11 = arith.constant 0 : index
    %c0_12 = arith.constant 0 : index
    %15 = vector.load %arg6[%c0_11, %c0_12] : memref<16x128xbf16, #tpu.memory_space<vmem>>, vector<16x128xbf16>
    tpu.vector_store %arg6[%c0_11, %c0_12], %14 {strides = array<i32>} : memref<16x128xbf16, #tpu.memory_space<vmem>>, vector<16x128xbf16>,
    return
  }
  func.func @transform_0(%arg0: i32) -> (i32, i32) {
    %c0_i32 = arith.constant 0 : i32
    %c0_i32_0 = arith.constant 0 : i32
    return %c0_i32, %arg0 : i32, i32
  }
  func.func @transform_1(%arg0: i32) -> (i32, i32) {
    %c0_i32 = arith.constant 0 : i32
    %c0_i32_0 = arith.constant 0 : i32
    return %c0_i32, %arg0 : i32, i32
  }
  func.func @transform_2(%arg0: i32) -> (i32, i32) {
    %c0_i32 = arith.constant 0 : i32
    %c0_i32_0 = arith.constant 0 : i32
    %c0_i32_1 = arith.constant 0 : i32
    return %c0_i32, %c0_i32_0 : i32, i32
  }
  func.func @transform_3(%arg0: i32) -> (i32, i32) {
    %c0_i32 = arith.constant 0 : i32
    %c0_i32_0 = arith.constant 0 : i32
    %c0_i32_1 = arith.constant 0 : i32
    return %c0_i32, %c0_i32_0 : i32, i32
  }
  func.func @transform_4(%arg0: i32) -> (i32, i32) {
    %c0_i32 = arith.constant 0 : i32
    %c0_i32_0 = arith.constant 0 : i32
    %c0_i32_1 = arith.constant 0 : i32
    return %c0_i32, %c0_i32_0 : i32, i32
  }
  func.func @transform_5(%arg0: i32) -> (i32, i32) {
    %c0_i32 = arith.constant 0 : i32
    %c0_i32_0 = arith.constant 0 : i32
    return %c0_i32, %arg0 : i32, i32
  }
}

module attributes {stable_mosaic.version = 11 : i64} {
  func.func @_tail_kernel(%arg0: i32, %arg1: memref<8x128xbf16, #tpu.memory_space<vmem>>, %arg2: memref<16x128xbf16, #tpu.memory_space<vmem>>, %arg3: memref<16x8xbf16, #tpu.memory_space<vmem>>, %arg4: memref<16x1xf32, #tpu.memory_space<vmem>>, %arg5: memref<5x16xbf16, #tpu.memory_space<vmem>>, %arg6: memref<5x1xf32, #tpu.memory_space<vmem>>, %arg7: memref<1x16xbf16, #tpu.memory_space<vmem>>, %arg8: memref<1x1xf32, #tpu.memory_space<vmem>>, %arg9: memref<8x8xbf16, #tpu.memory_space<vmem>>, %arg10: memref<8x5xbf16, #tpu.memory_space<vmem>>, %arg11: memref<8x1xf32, #tpu.memory_space<vmem>>, %arg12: memref<8x1xf32, #tpu.memory_space<vmem>>, %arg13: memref<1x8xbf16, #tpu.memory_space<vmem>>, %arg14: memref<1x1xf32, #tpu.memory_space<vmem>>, %arg15: memref<1x128xf32, #tpu.memory_space<vmem>>) attributes {dimension_semantics = [#tpu.dimension_semantics<parallel>], iteration_bounds = array<i64: 4>, scalar_prefetch = 0 : i64, scratch_operands = 0 : i64, tpu.core_type = #tpu.core_type<tc>, window_params = [{transform_indices = @transform_0, window_bounds = array<i64: 8, 128>}, {transform_indices = @transform_1, window_bounds = array<i64: 16, 128>}, {pipeline_mode = #tpu.pipeline_mode<synchronous>, transform_indices = @transform_2, window_bounds = array<i64: 16, 8>}, {pipeline_mode = #tpu.pipeline_mode<synchronous>, transform_indices = @transform_3, window_bounds = array<i64: 16, 1>}, {pipeline_mode = #tpu.pipeline_mode<synchronous>, transform_indices = @transform_4, window_bounds = array<i64: 5, 16>}, {pipeline_mode = #tpu.pipeline_mode<synchronous>, transform_indices = @transform_5, window_bounds = array<i64: 5, 1>}, {pipeline_mode = #tpu.pipeline_mode<synchronous>, transform_indices = @transform_6, window_bounds = array<i64: 1, 16>}, {pipeline_mode = #tpu.pipeline_mode<synchronous>, transform_indices = @transform_7, window_bounds = array<i64: 1, 1>}, {pipeline_mode = #tpu.pipeline_mode<synchronous>, transform_indices = @transform_8, window_bounds = array<i64: 8, 8>}, {pipeline_mode = #tpu.pipeline_mode<synchronous>, transform_indices = @transform_9, window_bounds = array<i64: 8, 5>}, {pipeline_mode = #tpu.pipeline_mode<synchronous>, transform_indices = @transform_10, window_bounds = array<i64: 8, 1>}, {pipeline_mode = #tpu.pipeline_mode<synchronous>, transform_indices = @transform_11, window_bounds = array<i64: 8, 1>}, {pipeline_mode = #tpu.pipeline_mode<synchronous>, transform_indices = @transform_12, window_bounds = array<i64: 1, 8>}, {pipeline_mode = #tpu.pipeline_mode<synchronous>, transform_indices = @transform_13, window_bounds = array<i64: 1, 1>}, {transform_indices = @transform_14, window_bounds = array<i64: 1, 128>}]} {
    %c0 = arith.constant 0 : index
    %c0_0 = arith.constant 0 : index
    %0 = vector.load %arg1[%c0, %c0_0] : memref<8x128xbf16, #tpu.memory_space<vmem>>, vector<8x128xbf16>
    %c0_1 = arith.constant 0 : index
    %c0_2 = arith.constant 0 : index
    %1 = vector.load %arg3[%c0_1, %c0_2] : memref<16x8xbf16, #tpu.memory_space<vmem>>, vector<16x8xbf16>
    %cst = arith.constant dense<0.000000e+00> : vector<16x128xf32>
    %2 = tpu.matmul %1, %0, %cst {dimension_numbers = #tpu.dot_dimension_numbers<[1], [0], [0], [1], [0, 0, 1, 1], [], []>} : vector<16x8xbf16>, vector<8x128xbf16>, vector<16x128xf32> -> vector<16x128xf32>
    %c0_3 = arith.constant 0 : index
    %c0_4 = arith.constant 0 : index
    %3 = vector.load %arg2[%c0_3, %c0_4] : memref<16x128xbf16, #tpu.memory_space<vmem>>, vector<16x128xbf16>
    %4 = arith.extf %3 : vector<16x128xbf16> to vector<16x128xf32>
    %5 = arith.addf %2, %4 : vector<16x128xf32>
    %c0_5 = arith.constant 0 : index
    %c0_6 = arith.constant 0 : index
    %6 = vector.load %arg4[%c0_5, %c0_6] : memref<16x1xf32, #tpu.memory_space<vmem>>, vector<16x1xf32>
    %7 = vector.broadcast %6 : vector<16x1xf32> to vector<16x128xf32>
    %8 = arith.addf %5, %7 : vector<16x128xf32>
    %cst_7 = arith.constant 0.000000e+00 : f32
    %9 = vector.broadcast %cst_7 : f32 to vector<16x128xf32>
    %10 = arith.maximumf %8, %9 : vector<16x128xf32>
    %11 = arith.truncf %10 : vector<16x128xf32> to vector<16x128xbf16>
    %c0_8 = arith.constant 0 : index
    %c0_9 = arith.constant 0 : index
    %12 = vector.load %arg5[%c0_8, %c0_9] : memref<5x16xbf16, #tpu.memory_space<vmem>>, vector<5x16xbf16>
    %cst_10 = arith.constant dense<0.000000e+00> : vector<5x128xf32>
    %13 = tpu.matmul %12, %11, %cst_10 {dimension_numbers = #tpu.dot_dimension_numbers<[1], [0], [0], [1], [0, 0, 1, 1], [], []>} : vector<5x16xbf16>, vector<16x128xbf16>, vector<5x128xf32> -> vector<5x128xf32>
    %c0_11 = arith.constant 0 : index
    %c0_12 = arith.constant 0 : index
    %14 = vector.load %arg6[%c0_11, %c0_12] : memref<5x1xf32, #tpu.memory_space<vmem>>, vector<5x1xf32>
    %15 = vector.broadcast %14 : vector<5x1xf32> to vector<5x128xf32>
    %16 = arith.addf %13, %15 : vector<5x128xf32>
    %c0_13 = arith.constant 0 : index
    %c0_14 = arith.constant 0 : index
    %17 = vector.load %arg7[%c0_13, %c0_14] : memref<1x16xbf16, #tpu.memory_space<vmem>>, vector<1x16xbf16>
    %cst_15 = arith.constant dense<0.000000e+00> : vector<1x128xf32>
    %18 = tpu.matmul %17, %11, %cst_15 {dimension_numbers = #tpu.dot_dimension_numbers<[1], [0], [0], [1], [0, 0, 1, 1], [], []>} : vector<1x16xbf16>, vector<16x128xbf16>, vector<1x128xf32> -> vector<1x128xf32>
    %c0_16 = arith.constant 0 : index
    %c0_17 = arith.constant 0 : index
    %19 = vector.load %arg8[%c0_16, %c0_17] : memref<1x1xf32, #tpu.memory_space<vmem>>, vector<1x1xf32>
    %20 = vector.broadcast %19 : vector<1x1xf32> to vector<1x128xf32>
    %21 = arith.addf %18, %20 : vector<1x128xf32>
    %c0_18 = arith.constant 0 : index
    %c0_19 = arith.constant 0 : index
    %22 = vector.load %arg9[%c0_18, %c0_19] : memref<8x8xbf16, #tpu.memory_space<vmem>>, vector<8x8xbf16>
    %cst_20 = arith.constant dense<0.000000e+00> : vector<8x128xf32>
    %23 = tpu.matmul %22, %0, %cst_20 {dimension_numbers = #tpu.dot_dimension_numbers<[1], [0], [0], [1], [0, 0, 1, 1], [], []>} : vector<8x8xbf16>, vector<8x128xbf16>, vector<8x128xf32> -> vector<8x128xf32>
    %c0_21 = arith.constant 0 : index
    %c0_22 = arith.constant 0 : index
    %24 = vector.load %arg10[%c0_21, %c0_22] : memref<8x5xbf16, #tpu.memory_space<vmem>>, vector<8x5xbf16>
    %25 = arith.truncf %16 : vector<5x128xf32> to vector<5x128xbf16>
    %cst_23 = arith.constant dense<0.000000e+00> : vector<8x128xf32>
    %26 = tpu.matmul %24, %25, %cst_23 {dimension_numbers = #tpu.dot_dimension_numbers<[1], [0], [0], [1], [0, 0, 1, 1], [], []>} : vector<8x5xbf16>, vector<5x128xbf16>, vector<8x128xf32> -> vector<8x128xf32>
    %27 = arith.addf %23, %26 : vector<8x128xf32>
    %c0_24 = arith.constant 0 : index
    %c0_25 = arith.constant 0 : index
    %28 = vector.load %arg11[%c0_24, %c0_25] : memref<8x1xf32, #tpu.memory_space<vmem>>, vector<8x1xf32>
    %29 = vector.broadcast %28 : vector<8x1xf32> to vector<8x128xf32>
    %30 = vector.broadcast %21 : vector<1x128xf32> to vector<8x128xf32>
    %31 = arith.mulf %29, %30 : vector<8x128xf32>
    %32 = arith.addf %27, %31 : vector<8x128xf32>
    %c0_26 = arith.constant 0 : index
    %c0_27 = arith.constant 0 : index
    %33 = vector.load %arg12[%c0_26, %c0_27] : memref<8x1xf32, #tpu.memory_space<vmem>>, vector<8x1xf32>
    %34 = vector.broadcast %33 : vector<8x1xf32> to vector<8x128xf32>
    %35 = arith.addf %32, %34 : vector<8x128xf32>
    %cst_28 = arith.constant 0.000000e+00 : f32
    %36 = vector.broadcast %cst_28 : f32 to vector<8x128xf32>
    %37 = arith.maximumf %35, %36 : vector<8x128xf32>
    %c0_29 = arith.constant 0 : index
    %c0_30 = arith.constant 0 : index
    %38 = vector.load %arg13[%c0_29, %c0_30] : memref<1x8xbf16, #tpu.memory_space<vmem>>, vector<1x8xbf16>
    %39 = arith.truncf %37 : vector<8x128xf32> to vector<8x128xbf16>
    %cst_31 = arith.constant dense<0.000000e+00> : vector<1x128xf32>
    %40 = tpu.matmul %38, %39, %cst_31 {dimension_numbers = #tpu.dot_dimension_numbers<[1], [0], [0], [1], [0, 0, 1, 1], [], []>} : vector<1x8xbf16>, vector<8x128xbf16>, vector<1x128xf32> -> vector<1x128xf32>
    %c0_32 = arith.constant 0 : index
    %c0_33 = arith.constant 0 : index
    %41 = vector.load %arg14[%c0_32, %c0_33] : memref<1x1xf32, #tpu.memory_space<vmem>>, vector<1x1xf32>
    %42 = vector.broadcast %41 : vector<1x1xf32> to vector<1x128xf32>
    %43 = arith.addf %40, %42 : vector<1x128xf32>
    %44 = arith.negf %43 : vector<1x128xf32>
    %45 = math.exp %44 : vector<1x128xf32>
    %cst_34 = arith.constant 1.000000e+00 : f32
    %46 = vector.broadcast %cst_34 : f32 to vector<1x128xf32>
    %47 = arith.addf %46, %45 : vector<1x128xf32>
    %48 = arith.divf %46, %47 : vector<1x128xf32>
    %c0_35 = arith.constant 0 : index
    %c0_36 = arith.constant 0 : index
    %49 = vector.load %arg15[%c0_35, %c0_36] : memref<1x128xf32, #tpu.memory_space<vmem>>, vector<1x128xf32>
    tpu.vector_store %arg15[%c0_35, %c0_36], %48 {strides = array<i32>} : memref<1x128xf32, #tpu.memory_space<vmem>>, vector<1x128xf32>,
    return
  }
  func.func @transform_0(%arg0: i32) -> (i32, i32) {
    %c0_i32 = arith.constant 0 : i32
    %c0_i32_0 = arith.constant 0 : i32
    return %c0_i32, %arg0 : i32, i32
  }
  func.func @transform_1(%arg0: i32) -> (i32, i32) {
    %c0_i32 = arith.constant 0 : i32
    %c0_i32_0 = arith.constant 0 : i32
    return %c0_i32, %arg0 : i32, i32
  }
  func.func @transform_2(%arg0: i32) -> (i32, i32) {
    %c0_i32 = arith.constant 0 : i32
    %c0_i32_0 = arith.constant 0 : i32
    %c0_i32_1 = arith.constant 0 : i32
    return %c0_i32, %c0_i32_0 : i32, i32
  }
  func.func @transform_3(%arg0: i32) -> (i32, i32) {
    %c0_i32 = arith.constant 0 : i32
    %c0_i32_0 = arith.constant 0 : i32
    %c0_i32_1 = arith.constant 0 : i32
    return %c0_i32, %c0_i32_0 : i32, i32
  }
  func.func @transform_4(%arg0: i32) -> (i32, i32) {
    %c0_i32 = arith.constant 0 : i32
    %c0_i32_0 = arith.constant 0 : i32
    %c0_i32_1 = arith.constant 0 : i32
    return %c0_i32, %c0_i32_0 : i32, i32
  }
  func.func @transform_5(%arg0: i32) -> (i32, i32) {
    %c0_i32 = arith.constant 0 : i32
    %c0_i32_0 = arith.constant 0 : i32
    %c0_i32_1 = arith.constant 0 : i32
    return %c0_i32, %c0_i32_0 : i32, i32
  }
  func.func @transform_6(%arg0: i32) -> (i32, i32) {
    %c0_i32 = arith.constant 0 : i32
    %c0_i32_0 = arith.constant 0 : i32
    %c0_i32_1 = arith.constant 0 : i32
    return %c0_i32, %c0_i32_0 : i32, i32
  }
  func.func @transform_7(%arg0: i32) -> (i32, i32) {
    %c0_i32 = arith.constant 0 : i32
    %c0_i32_0 = arith.constant 0 : i32
    %c0_i32_1 = arith.constant 0 : i32
    return %c0_i32, %c0_i32_0 : i32, i32
  }
  func.func @transform_8(%arg0: i32) -> (i32, i32) {
    %c0_i32 = arith.constant 0 : i32
    %c0_i32_0 = arith.constant 0 : i32
    %c0_i32_1 = arith.constant 0 : i32
    return %c0_i32, %c0_i32_0 : i32, i32
  }
  func.func @transform_9(%arg0: i32) -> (i32, i32) {
    %c0_i32 = arith.constant 0 : i32
    %c0_i32_0 = arith.constant 0 : i32
    %c0_i32_1 = arith.constant 0 : i32
    return %c0_i32, %c0_i32_0 : i32, i32
  }
  func.func @transform_10(%arg0: i32) -> (i32, i32) {
    %c0_i32 = arith.constant 0 : i32
    %c0_i32_0 = arith.constant 0 : i32
    %c0_i32_1 = arith.constant 0 : i32
    return %c0_i32, %c0_i32_0 : i32, i32
  }
  func.func @transform_11(%arg0: i32) -> (i32, i32) {
    %c0_i32 = arith.constant 0 : i32
    %c0_i32_0 = arith.constant 0 : i32
    %c0_i32_1 = arith.constant 0 : i32
    return %c0_i32, %c0_i32_0 : i32, i32
  }
  func.func @transform_12(%arg0: i32) -> (i32, i32) {
    %c0_i32 = arith.constant 0 : i32
    %c0_i32_0 = arith.constant 0 : i32
    %c0_i32_1 = arith.constant 0 : i32
    return %c0_i32, %c0_i32_0 : i32, i32
  }
  func.func @transform_13(%arg0: i32) -> (i32, i32) {
    %c0_i32 = arith.constant 0 : i32
    %c0_i32_0 = arith.constant 0 : i32
    %c0_i32_1 = arith.constant 0 : i32
    return %c0_i32, %c0_i32_0 : i32, i32
  }
  func.func @transform_14(%arg0: i32) -> (i32, i32) {
    %c0_i32 = arith.constant 0 : i32
    %c0_i32_0 = arith.constant 0 : i32
    return %c0_i32, %arg0 : i32, i32
  }
}

module attributes {stable_mosaic.version = 11 : i64} {
  func.func @_norm_kernel(%arg0: i32, %arg1: memref<2x256xf32, #tpu.memory_space<vmem>>, %arg2: memref<2x256xf32, #tpu.memory_space<vmem>>) attributes {dimension_semantics = [#tpu.dimension_semantics<parallel>], iteration_bounds = array<i64: 1>, scalar_prefetch = 0 : i64, scratch_operands = 0 : i64, tpu.core_type = #tpu.core_type<tc>, window_params = [{transform_indices = @transform_0, window_bounds = array<i64: 2, 256>}, {transform_indices = @transform_1, window_bounds = array<i64: 2, 256>}]} {
    %c0 = arith.constant 0 : index
    %c0_0 = arith.constant 0 : index
    %0 = vector.load %arg1[%c0, %c0_0] : memref<2x256xf32, #tpu.memory_space<vmem>>, vector<2x256xf32>
    %cst = arith.constant dense<0xFF800000> : vector<2xf32>
    %1 = vector.multi_reduction <maximumf>, %0, %cst [1] : vector<2x256xf32> to vector<2xf32>
    %2 = vector.shape_cast %1 : vector<2xf32> to vector<2x1xf32>
    %cst_1 = arith.constant 9.99999997E-7 : f32
    %3 = vector.broadcast %cst_1 : f32 to vector<2x1xf32>
    %4 = arith.addf %2, %3 : vector<2x1xf32>
    %5 = vector.broadcast %4 : vector<2x1xf32> to vector<2x256xf32>
    %6 = arith.divf %0, %5 : vector<2x256xf32>
    %c0_2 = arith.constant 0 : index
    %c0_3 = arith.constant 0 : index
    %7 = vector.load %arg2[%c0_2, %c0_3] : memref<2x256xf32, #tpu.memory_space<vmem>>, vector<2x256xf32>
    tpu.vector_store %arg2[%c0_2, %c0_3], %6 {strides = array<i32>} : memref<2x256xf32, #tpu.memory_space<vmem>>, vector<2x256xf32>,
    return
  }
  func.func @transform_0(%arg0: i32) -> (i32, i32) {
    %c0_i32 = arith.constant 0 : i32
    %c0_i32_0 = arith.constant 0 : i32
    return %arg0, %c0_i32 : i32, i32
  }
  func.func @transform_1(%arg0: i32) -> (i32, i32) {
    %c0_i32 = arith.constant 0 : i32
    %c0_i32_0 = arith.constant 0 : i32
    return %arg0, %c0_i32 : i32, i32
  }
}

</mosaic_0001>

<bundles_post_ra>
// kernel: tempsal_forward.9
= control target key start
LH: loop header
LB: loop body
LE: loop exit
PB: predicated region body
PF: predicated region fallthrough
CT: control target
= control target key end

     0   :  { %s318_s12 = smov 0   ;;  %s341_s0 = inlined_call_operand.vmem [shape: bf16[3,512], index: 0, kind: input, shape index: {}]   ;;  %s342_s1 = inlined_call_operand.vmem [shape: bf16[8,3], index: 1, kind: input, shape index: {}]   ;;  %s343_s2 = inlined_call_operand.vmem [shape: f32[8,1], index: 2, kind: input, shape index: {}]   ;;  %s344_s3 = inlined_call_operand.vmem [shape: bf16[8,512], index: 3, kind: output, shape index: {}]  }
   0x1 LB: > { %s263_s13 = sadd.s32 4294967295, %s293_s12   ;;  %p267_p0 = scmp.ge.s32.totalorder %s293_s12, 1  ;;  %s293_s12 = sphi %s318_s12, %s13_s12  }
   0x2   : > { %p136_p1 = scmp.lt.s32.totalorder %s293_s12, 5 }
   0x4   : > { %p137_p2 = pnand %p267_p0, %p136_p1 }
   0x5   : > { %p158_p3 = scmp.lt.s32.totalorder (!%p137_p2), %s263_s13, 3 }
   0x6   : > { %140 = sbr.rel (%p137_p2) target bundleno = 153 (0x99), region = 32 }
   0xb   : > { %v168_v0 = vld [vmem:[%s342_s1] sm:$0xf]  ;;  %v295_v1 = vmov 0   ;;  %v296_v2 = vmov 1   ;;  %v297_v5 = vmov 2   ;;  %s346_s13 = smov (!%p158_p3, %s263_s13), 3  ;;  %v176_v6 = vlaneseq }
   0xc   : > { %283 = vset.pattern.permute.xlu0 %v295_v1  ;;  %284 = vset.pattern.permute.xlu1 %v296_v2  ;;  %v169_v3 = vunpack.c.l.bf16 %v168_v0  ;;  %v170_v4 = vld [vmem:[%s343_s2] sm:$0xff]  ;;  %s268_s18 = sshll.u32 %s346_s13, 1  ;;  %s269_s22 = sshll.u32 %s346_s13, 2 }
   0xd   : > { %s161_s21 = scalar_lea.vmem %s341_s0, %s268_s18  ;;  %v177_v7 = vshrl.u32 %v176_v6, 7  ;;  %s165_s25 = scalar_lea.vmem %s344_s3, %s269_s22 }
   0xe   : > { %173 = vperm.xlu0 %283, %v169_v3   ;;  %188 = vperm.xlu1 %284, %v169_v3   ;;  %v166_v8 = vld [vmem:[%s161_s21] sm:$0x3] }
   0xf   : > { %v178_v9 = vsub.s32 0, %v177_v7  ;;  %v167_v10 = vunpack.c.l.bf16 %v166_v8  ;;  %v193_v11 = vsub.s32 1, %v177_v7  ;;  %v203_v12 = vsub.s32 2, %v177_v7 }
  0x11   : > { %v179_v13 = vrot.slane %v167_v10, %v178_v9  ;;  %v194_v16 = vrot.slane %v167_v10, %v193_v11  ;;  %v204_v17 = vrot.slane %v167_v10, %v203_v12 }
  0x12   : > { %183 = vperm.xlu0 %283, %v170_v4   ;;  %285 = vset.pattern.permute.xlu1 %v297_v5 }
  0x13   : > { %198 = vperm.xlu1 %285, %v169_v3  }
  0x16   : > { %286 = vset.pattern.permute.xlu0 %v297_v5 }
  0x89   : > { %v174_v14 = vpop.permute.xlu0 %173  ;;  %v189_v15 = vpop.permute.xlu1 %188 }
  0x8a   : > { %v180_v18 = vmul.f32 %v179_v13, %v174_v14  ;;  %v195_v20 = vmul.f32 %v194_v16, %v189_v15 }
  0x8d   : > { %v184_v19 = vpop.permute.xlu0 %183 }
  0x8e   : > { %v186_v21 = vadd.f32 %v184_v19, %v180_v18  ;;  %v199_v22 = vpop.permute.xlu1 %198 }
  0x8f   : > { %v205_v23 = vmul.f32 %v204_v17, %v199_v22 }
  0x90   : > { %v196_v24 = vadd.f32 %v195_v20, %v186_v21 }
  0x92   : > { %v206_v25 = vadd.f32 %v205_v23, %v196_v24 }
  0x94   : > { %v207_v26 = vmax.f32 %v206_v25, 0.0 }
  0x96   : > { %v208_v27 = vpack.c.bf16 %v207_v26, %v207_v26 }
  0x98   : > { %209 = vst [vmem:[%s165_s25] sm:$0xf] %v208_v27 }
  0x99 PF: > { %s13_s12 = sadd.s32 1, %s293_s12  }
  0x9a   : > { %p10_p4 = scmp.ge.s32.totalorder %s13_s12, 6  }
  0x9c   :  { %12 = sbr.rel (!%p10_p4) target bundleno = 1 (0x1), region = 62 }

// kernel: tempsal_forward.10
= control target key start
LH: loop header
LB: loop body
LE: loop exit
PB: predicated region body
PF: predicated region fallthrough
CT: control target
= control target key end

     0   :  { %vm39_vm0 = vcmask 1043456   ;;  %v124_v0 = vmov 0.0   ;;  %vm125_vm1 = vmmov 0   ;;  %vm35_vm2 = vcmask 64512   ;;  %s162_s0 = inlined_call_operand.vmem [shape: bf16[8,128], index: 0, kind: input, shape index: {}]   ;;  %s163_s1 = inlined_call_operand.vmem [shape: bf16[16,8], index: 1, kind: input, shape index: {}]   ;;  %s164_s2 = inlined_call_operand.vmem [shape: f32[16,1], index: 2, kind: input, shape index: {}]   ;;  %s165_s3 = inlined_call_operand.vmem [shape: bf16[16,128], index: 3, kind: output, shape index: {}]  }
   0x1   :  { %113 = vmatprep.subr.bf16.mxu0 %v124_v0  ;;  %v17_v1 = vld [vmem:[%s162_s0] sm:$0xf]  ;;  %115 = vmatprep.mubr.msk.bf16.mxu0 %vm125_vm1, %v124_v0  ;;  %v126_v5 = vmov 0   ;;  %v19_v6 = vld [vmem:[%s164_s2 + $0x8] sm:$0xff] }
   0x2   :  { %v41_v2 = vsel %vm39_vm0, %v17_v1, 0  ;;  %v123_v3 = vld [vmem:[%s163_s1] sm:$0xff]   ;;  %122 = vset.pattern.permute.xlu0 %v126_v5 }
   0x3   :  { %v18_v4 = vld [vmem:[%s164_s2] sm:$0xff]  ;;  %114 = vmatpush3.bf16.msra.mxu0 %v41_v2 }
   0x4   :  { %22 = vperm.xlu0 %122, %v18_v4  }
   0x6   :  { %116 = vmatmul.mubr.msk.bf16.vlgmr.msra.gmra.mxu0 %vm35_vm2, %v123_v3 }
   0x8   :  { %27 = vperm.xlu0 %122, %v19_v6  }
  0x7f   :  { %v23_v7 = vpop.permute.xlu0 %22 }
  0x83   :  { %v28_v11 = vpop.permute.xlu0 %27 }
  0xc6   :  { %v77_v8 = vpop.f32.mrf.mxu0 }
  0xc7   :  { %v78_v10 = vadd.f32 %v77_v8, %v23_v7 }
  0xc8   :  { %v117_v9 = vpop.f32.mrf.mxu0 }
  0xc9   :  { %v84_v15 = vmax.f32 %v78_v10, 0.0 }
  0xca   :  { %v80_v12 = vpop.f32.mrf.mxu0 }
  0xcb   :  { %v81_v13 = vadd.f32 %v80_v12, %v28_v11 }
  0xcc   :  { %v118_v14 = vpop.f32.mrf.mxu0 }
  0xcd   :  { %v85_v16 = vmax.f32 %v81_v13, 0.0 }
  0xcf   :  { %v109_v17 = vpack.c.bf16 %v85_v16, %v84_v15 }
  0xd1   :  { %110 = vst [vmem:[%s165_s3] sm:$0xff] %v109_v17  }

// kernel: tempsal_forward.11
= control target key start
LH: loop header
LB: loop body
LE: loop exit
PB: predicated region body
PF: predicated region fallthrough
CT: control target
= control target key end

     0   :  { %vm61_vm0 = vcmask 130048   ;;  %v174_v1 = vmov 0   ;;  %vm137_vm1 = vcmask 257024   ;;  %s234_s0 = inlined_call_operand.vmem [shape: bf16[16,32], index: 0, kind: input, shape index: {}]   ;;  %s235_s1 = inlined_call_operand.vmem [shape: bf16[32,16], index: 1, kind: input, shape index: {}]   ;;  %s236_s2 = inlined_call_operand.vmem [shape: f32[32,1], index: 2, kind: input, shape index: {}]   ;;  %s237_s3 = inlined_call_operand.vmem [shape: bf16[32,32], index: 3, kind: output, shape index: {}]  }
   0x1   :  { %v171_v0 = vld [vmem:[%s234_s0] sm:$0xff]   ;;  %170 = vset.pattern.permute.xlu1 %v174_v1  ;;  %169 = vset.pattern.permute.xlu0 %v174_v1  ;;  %v173_v3 = vld [vmem:[%s235_s1 + $0x8] sm:$0xff]   ;;  %v23_v4 = vld [vmem:[%s236_s2 + $0x10] sm:$0xff] }
   0x2   :  { %v172_v2 = vld [vmem:[%s235_s1] sm:$0xff]   ;;  %162 = vmatprep.subr.bf16.mxu0 %v171_v0  ;;  %37 = vperm.xlu1 %170, %v23_v4   ;;  %v24_v6 = vld [vmem:[%s236_s2 + $0x18] sm:$0xff]  ;;  %v22_v7 = vld [vmem:[%s236_s2 + $0x8] sm:$0xff] }
   0x3   :  { %163 = vmatpush3.bf16.msra.mxu0 %v171_v0  ;;  %164 = vmatprep.mubr.msk.bf16.mxu0 %vm61_vm0, %v172_v2  ;;  %v21_v5 = vld [vmem:[%s236_s2] sm:$0xff] }
   0x4   :  { %27 = vperm.xlu0 %169, %v21_v5  }
   0x6   :  { %165 = vmatmul.mubr.msk.bf16.vlgmr.msra.gmra.mxu0 %vm61_vm0, %v173_v3  ;;  %42 = vperm.xlu1 %170, %v24_v6  }
   0x8   :  { %32 = vperm.xlu0 %169, %v22_v7  }
  0x7d   :  { %v38_v8 = vpop.permute.xlu1 %37 }
  0x7f   :  { %v28_v9 = vpop.permute.xlu0 %27 }
  0x81   :  { %v43_v15 = vpop.permute.xlu1 %42 }
  0x83   :  { %v33_v20 = vpop.permute.xlu0 %32 }
  0xc6   :  { %v166_v10 = vpop.f32.mrf.mxu0 }
  0xc7   :  { %v111_v11 = vadd.f32 %v166_v10, %v38_v8 }
  0xc8   :  { %v102_v12 = vpop.f32.mrf.mxu0 }
  0xc9   :  { %v119_v13 = vmax.f32 %v111_v11, 0.0  ;;  %v103_v14 = vadd.f32 %v102_v12, %v28_v9 }
  0xca   :  { %v167_v16 = vpop.f32.mrf.mxu0 }
  0xcb   :  { %v157_v17 = vpack.c.bf16 %v119_v13, %v119_v13  ;;  %v117_v18 = vmax.f32 %v103_v14, 0.0  ;;  %v114_v19 = vadd.f32 %v167_v16, %v43_v15 }
  0xcc   :  { %v105_v21 = vpop.f32.mrf.mxu0 }
  0xcd   :  { %140 = vst.msk [vmem:[%s237_s3 + $0x8] sm:$0xf] %vm137_vm1, %v157_v17  ;;  %v155_v22 = vpack.c.bf16 %v117_v18, %v117_v18  ;;  %v120_v23 = vmax.f32 %v114_v19, 0.0  ;;  %v106_v24 = vadd.f32 %v105_v21, %v33_v20 }
  0xcf   :  { %138 = vst.msk [vmem:[%s237_s3] sm:$0xf] %vm137_vm1, %v155_v22  ;;  %v158_v25 = vpack.c.bf16 %v120_v23, %v120_v23  ;;  %v118_v26 = vmax.f32 %v106_v24, 0.0 }
  0xd1   :  { %141 = vst.msk [vmem:[%s237_s3 + $0xc] sm:$0xf] %vm137_vm1, %v158_v25  ;;  %v156_v27 = vpack.c.bf16 %v118_v26, %v118_v26 }
  0xd3   :  { %139 = vst.msk [vmem:[%s237_s3 + $0x4] sm:$0xf] %vm137_vm1, %v156_v27 }

// kernel: tempsal_forward.12
= control target key start
LH: loop header
LB: loop body
LE: loop exit
PB: predicated region body
PF: predicated region fallthrough
CT: control target
= control target key end

     0   :  { %v187_v1 = vmov 0   ;;  %vm69_vm0 = vcmask 261120   ;;  %vm145_vm1 = vcmask 60416   ;;  %s250_s0 = inlined_call_operand.vmem [shape: bf16[32,8], index: 0, kind: input, shape index: {}]   ;;  %s251_s1 = inlined_call_operand.vmem [shape: bf16[32,32], index: 1, kind: input, shape index: {}]   ;;  %s252_s2 = inlined_call_operand.vmem [shape: f32[32,1], index: 2, kind: input, shape index: {}]   ;;  %s253_s3 = inlined_call_operand.vmem [shape: bf16[32,8], index: 3, kind: output, shape index: {}]  }
   0x1   :  { %v183_v0 = vld [vmem:[%s250_s0 + $0x8] sm:$0xff]   ;;  %182 = vset.pattern.permute.xlu1 %v187_v1  ;;  %181 = vset.pattern.permute.xlu0 %v187_v1  ;;  %v184_v2 = vld [vmem:[%s250_s0] sm:$0xff]   ;;  %v25_v4 = vld [vmem:[%s252_s2 + $0x10] sm:$0xff] }
   0x2   :  { %172 = vmatprep.subr.bf16.mxu0 %v183_v0  ;;  %v185_v3 = vld [vmem:[%s251_s1] sm:$0xff]   ;;  %39 = vperm.xlu1 %182, %v25_v4   ;;  %v186_v6 = vld [vmem:[%s251_s1 + $0x8] sm:$0xff]   ;;  %v26_v7 = vld [vmem:[%s252_s2 + $0x18] sm:$0xff] }
   0x3   :  { %173 = vmatpush3.bf16.msra.mxu0 %v183_v0  ;;  %176 = vmatprep.mubr.msk.bf16.mxu0 %vm69_vm0, %v185_v3  ;;  %v23_v5 = vld [vmem:[%s252_s2] sm:$0xff]  ;;  %v24_v8 = vld [vmem:[%s252_s2 + $0x8] sm:$0xff] }
   0x4   :  { %174 = vmatprep.subr.bf16.mxu0 %v184_v2  ;;  %29 = vperm.xlu0 %181, %v23_v5  }
   0x6   :  { %44 = vperm.xlu1 %182, %v26_v7  }
   0x7   :  { %175 = vmatpush3.bf16.msra.mxu0 %v184_v2 }
   0x8   :  { %34 = vperm.xlu0 %181, %v24_v8  }
   0xa   :  { %177 = vmatmul.mubr.msk.bf16.vlgmr.msra.gmra.mxu0 %vm69_vm0, %v186_v6 }
  0x7d   :  { %v40_v9 = vpop.permute.xlu1 %39 }
  0x7f   :  { %v30_v10 = vpop.permute.xlu0 %29 }
  0x81   :  { %v45_v16 = vpop.permute.xlu1 %44 }
  0x83   :  { %v35_v21 = vpop.permute.xlu0 %34 }
  0xca   :  { %v178_v11 = vpop.f32.mrf.mxu0 }
  0xcb   :  { %v119_v12 = vadd.f32 %v178_v11, %v40_v9 }
  0xcc   :  { %v110_v13 = vpop.f32.mrf.mxu0 }
  0xcd   :  { %v127_v14 = vmax.f32 %v119_v12, 0.0  ;;  %v111_v15 = vadd.f32 %v110_v13, %v30_v10 }
  0xce   :  { %v179_v17 = vpop.f32.mrf.mxu0 }
  0xcf   :  { %v166_v18 = vpack.c.bf16 %v127_v14, %v127_v14  ;;  %v125_v19 = vmax.f32 %v111_v15, 0.0  ;;  %v122_v20 = vadd.f32 %v179_v17, %v45_v16 }
  0xd0   :  { %v113_v22 = vpop.f32.mrf.mxu0 }
  0xd1   :  { %148 = vst.msk [vmem:[%s253_s3 + $0x8] sm:$0xf] %vm145_vm1, %v166_v18  ;;  %v164_v23 = vpack.c.bf16 %v125_v19, %v125_v19  ;;  %v128_v24 = vmax.f32 %v122_v20, 0.0  ;;  %v114_v25 = vadd.f32 %v113_v22, %v35_v21 }
  0xd3   :  { %146 = vst.msk [vmem:[%s253_s3] sm:$0xf] %vm145_vm1, %v164_v23  ;;  %v167_v26 = vpack.c.bf16 %v128_v24, %v128_v24  ;;  %v126_v27 = vmax.f32 %v114_v25, 0.0 }
  0xd5   :  { %149 = vst.msk [vmem:[%s253_s3 + $0xc] sm:$0xf] %vm145_vm1, %v167_v26  ;;  %v165_v28 = vpack.c.bf16 %v126_v27, %v126_v27 }
  0xd7   :  { %147 = vst.msk [vmem:[%s253_s3 + $0x4] sm:$0xf] %vm145_vm1, %v165_v28 }

// kernel: tempsal_forward.13
= control target key start
LH: loop header
LB: loop body
LE: loop exit
PB: predicated region body
PF: predicated region fallthrough
CT: control target
= control target key end

     0   :  { %v287_v1 = vmov 0   ;;  %vm107_vm0 = vcmask 261120   ;;  %vm217_vm1 = vcmask 60416   ;;  %s386_s0 = inlined_call_operand.vmem [shape: bf16[32,8], index: 0, kind: input, shape index: {}]   ;;  %s387_s1 = inlined_call_operand.vmem [shape: bf16[64,32], index: 1, kind: input, shape index: {}]   ;;  %s388_s2 = inlined_call_operand.vmem [shape: f32[64,1], index: 2, kind: input, shape index: {}]   ;;  %s389_s3 = inlined_call_operand.vmem [shape: bf16[64,8], index: 3, kind: output, shape index: {}]  }
   0x1   :  { %v281_v0 = vld [vmem:[%s386_s0 + $0x8] sm:$0xff]   ;;  %280 = vset.pattern.permute.xlu1 %v287_v1  ;;  %279 = vset.pattern.permute.xlu0 %v287_v1  ;;  %v282_v2 = vld [vmem:[%s386_s0] sm:$0xff]   ;;  %v284_v4 = vld [vmem:[%s387_s1 + $0x10] sm:$0xff]  }
   0x2   :  { %262 = vmatprep.subr.bf16.mxu0 %v281_v0  ;;  %274 = vmatprep.subr.bf16.mxu1 %v281_v0  ;;  %v283_v3 = vld [vmem:[%s387_s1] sm:$0xff]   ;;  %v285_v5 = vld [vmem:[%s387_s1 + $0x8] sm:$0xff]   ;;  %v286_v6 = vld [vmem:[%s387_s1 + $0x18] sm:$0xff]  }
   0x3   :  { %263 = vmatpush3.bf16.msra.mxu0 %v281_v0  ;;  %276 = vmatpush3.bf16.msra.mxu1 %v281_v0  ;;  %v29_v7 = vld [vmem:[%s388_s2 + $0x10] sm:$0xff]  ;;  %v27_v8 = vld [vmem:[%s388_s2] sm:$0xff]  ;;  %v30_v9 = vld [vmem:[%s388_s2 + $0x18] sm:$0xff] }
   0x4   :  { %264 = vmatprep.subr.bf16.mxu0 %v282_v2  ;;  %275 = vmatprep.subr.bf16.mxu1 %v282_v2  ;;  %v28_v10 = vld [vmem:[%s388_s2 + $0x8] sm:$0xff]  ;;  %v31_v12 = vld [vmem:[%s388_s2 + $0x20] sm:$0xff]  ;;  %v34_v13 = vld [vmem:[%s388_s2 + $0x38] sm:$0xff] }
   0x5   :  { %266 = vmatprep.mubr.msk.bf16.mxu0 %vm107_vm0, %v283_v3  ;;  %270 = vmatprep.mubr.msk.bf16.mxu1 %vm107_vm0, %v284_v4  ;;  %v32_v11 = vld [vmem:[%s388_s2 + $0x28] sm:$0xff]  ;;  %v33_v14 = vld [vmem:[%s388_s2 + $0x30] sm:$0xff] }
   0x6   :  { %47 = vperm.xlu1 %280, %v29_v7   ;;  %37 = vperm.xlu0 %279, %v27_v8  }
   0x7   :  { %265 = vmatpush3.bf16.msra.mxu0 %v282_v2  ;;  %277 = vmatpush3.bf16.msra.mxu1 %v282_v2 }
   0xa   :  { %267 = vmatmul.mubr.msk.bf16.vlgmr.msra.gmra.mxu0 %vm107_vm0, %v285_v5  ;;  %271 = vmatmul.mubr.msk.bf16.vlgmr.msra.gmra.mxu1 %vm107_vm0, %v286_v6 }
   0xb   :  { %52 = vperm.xlu1 %280, %v30_v9   ;;  %42 = vperm.xlu0 %279, %v28_v10  }
   0xf   :  { %62 = vperm.xlu1 %280, %v32_v11   ;;  %57 = vperm.xlu0 %279, %v31_v12  }
  0x13   :  { %72 = vperm.xlu1 %280, %v34_v13   ;;  %67 = vperm.xlu0 %279, %v33_v14  }
  0x81   :  { %v38_v15 = vpop.permute.xlu0 %37  ;;  %v48_v16 = vpop.permute.xlu1 %47 }
  0x86   :  { %v43_v17 = vpop.permute.xlu0 %42  ;;  %v53_v18 = vpop.permute.xlu1 %52 }
  0x8a   :  { %v58_v19 = vpop.permute.xlu0 %57  ;;  %v63_v20 = vpop.permute.xlu1 %62 }
  0x8e   :  { %v68_v21 = vpop.permute.xlu0 %67  ;;  %v73_v28 = vpop.permute.xlu1 %72 }
  0xca   :  { %v268_v22 = vpop.f32.mrf.mxu0  ;;  %v272_v23 = vpop.f32.mrf.mxu1 }
  0xcb   :  { %v163_v24 = vadd.f32 %v268_v22, %v48_v16  ;;  %v179_v25 = vadd.f32 %v272_v23, %v68_v21 }
  0xcc   :  { %v154_v26 = vpop.f32.mrf.mxu0  ;;  %v170_v27 = vpop.f32.mrf.mxu1 }
  0xcd   :  { %v250_v29 = vpack.c.bf16 %v163_v24, %v163_v24  ;;  %v254_v30 = vpack.c.bf16 %v179_v25, %v179_v25  ;;  %v155_v31 = vadd.f32 %v154_v26, %v38_v15  ;;  %v171_v32 = vadd.f32 %v170_v27, %v58_v19 }
  0xce   :  { %v269_v33 = vpop.f32.mrf.mxu0  ;;  %v273_v34 = vpop.f32.mrf.mxu1 }
  0xcf   :  { %220 = vst.msk [vmem:[%s389_s3 + $0x8] sm:$0xf] %vm217_vm1, %v250_v29  ;;  %224 = vst.msk [vmem:[%s389_s3 + $0x18] sm:$0xf] %vm217_vm1, %v254_v30  ;;  %v248_v35 = vpack.c.bf16 %v155_v31, %v155_v31  ;;  %v252_v36 = vpack.c.bf16 %v171_v32, %v171_v32  ;;  %v166_v37 = vadd.f32 %v269_v33, %v53_v18 }
  0xd0   :  { %v182_v38 = vadd.f32 %v273_v34, %v73_v28  ;;  %v157_v39 = vpop.f32.mrf.mxu0  ;;  %v173_v40 = vpop.f32.mrf.mxu1 }
  0xd1   :  { %218 = vst.msk [vmem:[%s389_s3] sm:$0xf] %vm217_vm1, %v248_v35  ;;  %222 = vst.msk [vmem:[%s389_s3 + $0x10] sm:$0xf] %vm217_vm1, %v252_v36  ;;  %v251_v41 = vpack.c.bf16 %v166_v37, %v166_v37  ;;  %v158_v43 = vadd.f32 %v157_v39, %v43_v17  ;;  %v174_v44 = vadd.f32 %v173_v40, %v63_v20 }
  0xd2   :  { %v255_v42 = vpack.c.bf16 %v182_v38, %v182_v38 }
  0xd3   :  { %221 = vst.msk [vmem:[%s389_s3 + $0xc] sm:$0xf] %vm217_vm1, %v251_v41  ;;  %v249_v45 = vpack.c.bf16 %v158_v43, %v158_v43  ;;  %v253_v46 = vpack.c.bf16 %v174_v44, %v174_v44 }
  0xd4   :  { %225 = vst.msk [vmem:[%s389_s3 + $0x1c] sm:$0xf] %vm217_vm1, %v255_v42 }
  0xd5   :  { %219 = vst.msk [vmem:[%s389_s3 + $0x4] sm:$0xf] %vm217_vm1, %v249_v45  ;;  %223 = vst.msk [vmem:[%s389_s3 + $0x14] sm:$0xf] %vm217_vm1, %v253_v46 }

// kernel: tempsal_forward.14
= control target key start
LH: loop header
LB: loop body
LE: loop exit
PB: predicated region body
PF: predicated region fallthrough
CT: control target
= control target key end

     0   :  { %v410_v1 = vmov 0   ;;  %vm81_vm0 = vcmask 261120   ;;  %vm241_vm1 = vcmask 523264   ;;  %vm313_vm2 = vcmask 257024   ;;  %s519_s0 = inlined_call_operand.vmem [shape: bf16[32,32], index: 0, kind: input, shape index: {}]   ;;  %s520_s2 = inlined_call_operand.vmem [shape: bf16[64,32], index: 2, kind: input, shape index: {}]   ;;  %s521_s3 = inlined_call_operand.vmem [shape: f32[64,1], index: 3, kind: input, shape index: {}]   ;;  %s522_s4 = inlined_call_operand.vmem [shape: bf16[32,64], index: 4, kind: input, shape index: {}]   ;;  %s523_s1 = inlined_call_operand.vmem [shape: bf16[64,32], index: 1, kind: input, shape index: {}]   ;;  %s524_s5 = inlined_call_operand.vmem [shape: bf16[32,32], index: 5, kind: output, shape index: {}]  }
   0x1   :  { %v402_v0 = vld [vmem:[%s519_s0 + $0x8] sm:$0xff]   ;;  %400 = vset.pattern.permute.xlu0 %v410_v1  ;;  %401 = vset.pattern.permute.xlu1 %v410_v1  ;;  %v403_v2 = vld [vmem:[%s519_s0] sm:$0xff]   ;;  %v165_v5 = vld [vmem:[%s521_s3 + $0x30] sm:$0xff] }
   0x2   :  { %375 = vmatprep.subr.bf16.mxu0 %v402_v0  ;;  %v404_v3 = vld [vmem:[%s520_s2] sm:$0xff]   ;;  %v405_v4 = vld [vmem:[%s520_s2 + $0x8] sm:$0xff]   ;;  %v406_v7 = vld [vmem:[%s520_s2 + $0x10] sm:$0xff]   ;;  %199 = vperm.xlu0 %400, %v165_v5  }
   0x3   :  { %376 = vmatpush3.bf16.msra.mxu0 %v402_v0  ;;  %379 = vmatprep.mubr.msk.bf16.mxu0 %vm81_vm0, %v404_v3  ;;  %v163_v6 = vld [vmem:[%s521_s3 + $0x20] sm:$0xff]  ;;  %v166_v8 = vld [vmem:[%s521_s3 + $0x38] sm:$0xff]  ;;  %v164_v9 = vld [vmem:[%s521_s3 + $0x28] sm:$0xff] }
   0x4   :  { %377 = vmatprep.subr.bf16.mxu0 %v403_v2  ;;  %189 = vperm.xlu1 %401, %v163_v6   ;;  %v161_v10 = vld [vmem:[%s521_s3 + $0x10] sm:$0xff]  ;;  %v162_v11 = vld [vmem:[%s521_s3 + $0x18] sm:$0xff]  ;;  %v159_v13 = vld [vmem:[%s521_s3] sm:$0xff] }
   0x5   :  { %v407_v12 = vld [vmem:[%s520_s2 + $0x18] sm:$0xff]   ;;  %v160_v14 = vld [vmem:[%s521_s3 + $0x8] sm:$0xff]  ;;  %v408_v15 = vld [vmem:[%s522_s4] sm:$0xff]  }
   0x6   :  { %204 = vperm.xlu0 %400, %v166_v8   ;;  %395 = vmatprep.mubr.msk.bf16.mxu1 %vm241_vm1, %v408_v15  ;;  %v362_v20 = vld [vmem:[%s523_s1 + $0x18] sm:$0xff]   ;;  %v361_v22 = vld [vmem:[%s523_s1 + $0x10] sm:$0xff]   ;;  %v360_v26 = vld [vmem:[%s523_s1 + $0x8] sm:$0xff]  }
   0x7   :  { %378 = vmatpush3.bf16.msra.mxu0 %v403_v2  ;;  %v358_v23 = vunpack.c.l.bf16 %v362_v20  ;;  %v354_v27 = vunpack.c.l.bf16 %v361_v22  ;;  %v351_v29 = vunpack.c.h.bf16 %v360_v26  ;;  %v359_v32 = vunpack.c.h.bf16 %v362_v20  ;;  %v345_v37 = vld [vmem:[%s523_s1] sm:$0xff]   ;;  %v409_v8 = vld [vmem:[%s522_s4 + $0x8] sm:$0xff]  }
   0x8   :  { %194 = vperm.xlu1 %401, %v164_v9   ;;  %v350_v33 = vunpack.c.l.bf16 %v360_v26  ;;  %v355_v36 = vunpack.c.h.bf16 %v361_v22  ;;  %v347_v41 = vunpack.c.h.bf16 %v345_v37  ;;  %v346_v47 = vunpack.c.l.bf16 %v345_v37 }
   0xa   :  { %380 = vmatmul.mubr.msk.bf16.vlgmr.msra.gmra.mxu0 %vm81_vm0, %v405_v4  ;;  %179 = vperm.xlu0 %400, %v161_v10  }
   0xb   :  { %383 = vmatprep.mubr.msk.bf16.mxu0 %vm81_vm0, %v406_v7 }
   0xc   :  { %184 = vperm.xlu1 %401, %v162_v11  }
   0xe   :  { %169 = vperm.xlu0 %400, %v159_v13  }
  0x10   :  { %174 = vperm.xlu1 %401, %v160_v14  }
  0x12   :  { %384 = vmatmul.mubr.msk.bf16.gmra.mxu0 %vm81_vm0, %v407_v12 }
  0x7d   :  { %v200_v18 = vpop.permute.xlu0 %199 }
  0x7f   :  { %v190_v16 = vpop.permute.xlu1 %189 }
  0x81   :  { %v205_v28 = vpop.permute.xlu0 %204 }
  0x83   :  { %v195_v24 = vpop.permute.xlu1 %194 }
  0x85   :  { %v180_v44 = vpop.permute.xlu0 %179 }
  0x87   :  { %v185_v38 = vpop.permute.xlu1 %184 }
  0x89   :  { %v170_v62 = vpop.permute.xlu0 %169 }
  0x8b   :  { %v175_v57 = vpop.permute.xlu1 %174 }
  0xca   :  { %v381_v17 = vpop.f32.mrf.mxu0 }
  0xcb   :  { %v137_v45 = vadd.f32 %v381_v17, %v350_v33 }
  0xcc   :  { %v128_v19 = vpop.f32.mrf.mxu0 }
  0xcd   :  { %v209_v56 = vadd.f32 %v180_v44, %v137_v45  ;;  %v129_v58 = vadd.f32 %v346_v47, %v128_v19 }
  0xce   :  { %v382_v21 = vpop.f32.mrf.mxu0 }
  0xcf   :  { %v140_v39 = vadd.f32 %v382_v21, %v351_v29  ;;  %v217_v2 = vmax.f32 %v209_v56, 0.0  ;;  %v207_v3 = vadd.f32 %v170_v62, %v129_v58 }
  0xd0   :  { %v131_v25 = vpop.f32.mrf.mxu0 }
  0xd1   :  { %v210_v51 = vadd.f32 %v185_v38, %v140_v39  ;;  %v132_v52 = vadd.f32 %v347_v41, %v131_v25  ;;  %v215_v6 = vmax.f32 %v207_v3, 0.0 }
  0xd2   :  { %v385_v30 = vpop.f32.mrf.mxu0 }
  0xd3   :  { %v153_v31 = vadd.f32 %v385_v30, %v358_v23  ;;  %v218_v63 = vmax.f32 %v210_v51, 0.0  ;;  %v208_v0 = vadd.f32 %v175_v57, %v132_v52 }
  0xd4   :  { %v144_v34 = vpop.f32.mrf.mxu0 }
  0xd5   :  { %v145_v35 = vadd.f32 %v354_v27, %v144_v34  ;;  %v213_v42 = vadd.f32 %v200_v18, %v153_v31  ;;  %v216_v4 = vmax.f32 %v208_v0, 0.0  ;;  %v228_v5 = vpack.c.bf16 %v218_v63, %v217_v2 }
  0xd6   :  { %v386_v40 = vpop.f32.mrf.mxu0 }
  0xd7   :  { %v156_v43 = vadd.f32 %v386_v40, %v359_v32  ;;  %v211_v48 = vadd.f32 %v190_v16, %v145_v35  ;;  %v221_v53 = vmax.f32 %v213_v42, 0.0  ;;  %v227_v7 = vpack.c.bf16 %v216_v4, %v215_v6 }
  0xd8   :  { %v147_v46 = vpop.f32.mrf.mxu0 }
  0xd9   :  { %v214_v49 = vadd.f32 %v205_v28, %v156_v43  ;;  %v148_v50 = vadd.f32 %v355_v36, %v147_v46  ;;  %v219_v59 = vmax.f32 %v211_v48, 0.0 }
  0xdb   :  { %v222_v54 = vmax.f32 %v214_v49, 0.0  ;;  %v212_v55 = vadd.f32 %v195_v24, %v148_v50 }
  0xdd   :  { %v220_v60 = vmax.f32 %v212_v55, 0.0  ;;  %v230_v61 = vpack.c.bf16 %v222_v54, %v221_v53 }
  0xdf   :  { %387 = vmatprep.subr.bf16.mxu1 %v230_v61  ;;  %v229_v1 = vpack.c.bf16 %v220_v60, %v219_v59 }
  0xe0   :  { %388 = vmatpush3.bf16.msra.mxu1 %v230_v61 }
  0xe1   :  { %389 = vmatprep.subr.bf16.mxu1 %v229_v1 }
  0xe4   :  { %390 = vmatpush3.bf16.msra.mxu1 %v229_v1 }
  0xe5   :  { %391 = vmatprep.subr.bf16.mxu1 %v228_v5 }
  0xe8   :  { %392 = vmatpush3.bf16.msra.mxu1 %v228_v5 }
  0xe9   :  { %393 = vmatprep.subr.bf16.mxu1 %v227_v7 }
  0xec   :  { %394 = vmatpush3.bf16.msra.mxu1 %v227_v7 }
  0xef   :  { %396 = vmatmul.mubr.msk.bf16.vlgmr.msra.gmra.mxu1 %vm241_vm1, %v409_v8 }
 0x1af   :  { %v397_v9 = vpop.f32.mrf.mxu1 }
 0x1b0   :  { %v342_v10 = vpack.c.bf16 %v397_v9, %v397_v9 }
 0x1b1   :  { %v282_v11 = vpop.f32.mrf.mxu1 }
 0x1b2   :  { %316 = vst.msk [vmem:[%s524_s5 + $0x8] sm:$0xf] %vm313_vm2, %v342_v10  ;;  %v340_v12 = vpack.c.bf16 %v282_v11, %v282_v11 }
 0x1b3   :  { %v398_v13 = vpop.f32.mrf.mxu1 }
 0x1b4   :  { %314 = vst.msk [vmem:[%s524_s5] sm:$0xf] %vm313_vm2, %v340_v12  ;;  %v343_v14 = vpack.c.bf16 %v398_v13, %v398_v13 }
 0x1b5   :  { %v285_v15 = vpop.f32.mrf.mxu1 }
 0x1b6   :  { %317 = vst.msk [vmem:[%s524_s5 + $0xc] sm:$0xf] %vm313_vm2, %v343_v14  ;;  %v341_v16 = vpack.c.bf16 %v285_v15, %v285_v15 }
 0x1b8   :  { %315 = vst.msk [vmem:[%s524_s5 + $0x4] sm:$0xf] %vm313_vm2, %v341_v16 }

// kernel: tempsal_forward.15
= control target key start
LH: loop header
LB: loop body
LE: loop exit
PB: predicated region body
PF: predicated region fallthrough
CT: control target
= control target key end

     0   :  { %vm51_vm0 = vcmask 130048   ;;  %v261_v1 = vmov 0   ;;  %v262_v8 = vmov 0.0   ;;  %vm263_vm1 = vmmov 0   ;;  %s329_s0 = inlined_call_operand.vmem [shape: bf16[16,128], index: 0, kind: input, shape index: {}]   ;;  %s330_s2 = inlined_call_operand.vmem [shape: bf16[32,16], index: 2, kind: input, shape index: {}]   ;;  %s331_s3 = inlined_call_operand.vmem [shape: f32[32,1], index: 3, kind: input, shape index: {}]   ;;  %s332_s4 = inlined_call_operand.vmem [shape: bf16[16,32], index: 4, kind: input, shape index: {}]   ;;  %s333_s1 = inlined_call_operand.vmem [shape: bf16[32,128], index: 1, kind: input, shape index: {}]   ;;  %s334_s5 = inlined_call_operand.vmem [shape: bf16[16,128], index: 5, kind: output, shape index: {}]  }
   0x1   :  { %v257_v0 = vld [vmem:[%s329_s0] sm:$0xff]   ;;  %255 = vset.pattern.permute.xlu0 %v261_v1  ;;  %256 = vset.pattern.permute.xlu1 %v261_v1  ;;  %v259_v3 = vld [vmem:[%s330_s2 + $0x8] sm:$0xff]   ;;  %v109_v4 = vld [vmem:[%s331_s3 + $0x10] sm:$0xff]  ;;  %vm148_vm2 = vcmask 261120  }
   0x2   :  { %v258_v2 = vld [vmem:[%s330_s2] sm:$0xff]   ;;  %238 = vmatprep.subr.bf16.mxu0 %v257_v0  ;;  %123 = vperm.xlu0 %255, %v109_v4   ;;  %v110_v6 = vld [vmem:[%s331_s3 + $0x18] sm:$0xff]  ;;  %v108_v7 = vld [vmem:[%s331_s3 + $0x8] sm:$0xff] }
   0x3   :  { %239 = vmatpush3.bf16.msra.mxu0 %v257_v0  ;;  %240 = vmatprep.mubr.msk.bf16.mxu0 %vm51_vm0, %v258_v2  ;;  %v107_v5 = vld [vmem:[%s331_s3] sm:$0xff]  ;;  %v231_v9 = vld [vmem:[%s333_s1 + $0x8] sm:$0xff]  }
   0x4   :  { %113 = vperm.xlu1 %256, %v107_v5   ;;  %244 = vmatprep.subr.bf16.mxu1 %v262_v8  ;;  %v224_v10 = vunpack.c.l.bf16 %v231_v9  ;;  %v219_v11 = vld [vmem:[%s333_s1] sm:$0xff]   ;;  %v225_v16 = vunpack.c.h.bf16 %v231_v9 }
   0x5   :  { %248 = vmatprep.mubr.msk.bf16.mxu1 %vm263_vm1, %v262_v8  ;;  %v220_v15 = vunpack.c.l.bf16 %v219_v11  ;;  %v221_v19 = vunpack.c.h.bf16 %v219_v11  ;;  %v260_v37 = vld [vmem:[%s332_s4] sm:$0xff]  }
   0x6   :  { %241 = vmatmul.mubr.msk.bf16.vlgmr.msra.gmra.mxu0 %vm51_vm0, %v259_v3  ;;  %128 = vperm.xlu0 %255, %v110_v6  }
   0x8   :  { %118 = vperm.xlu1 %256, %v108_v7  }
  0x7d   :  { %v124_v12 = vpop.permute.xlu0 %123 }
  0x7f   :  { %v114_v17 = vpop.permute.xlu1 %113 }
  0x81   :  { %v129_v24 = vpop.permute.xlu0 %128 }
  0x83   :  { %v119_v28 = vpop.permute.xlu1 %118 }
  0xc6   :  { %v242_v13 = vpop.f32.mrf.mxu0 }
  0xc7   :  { %v101_v14 = vadd.f32 %v242_v13, %v224_v10 }
  0xc8   :  { %v92_v18 = vpop.f32.mrf.mxu0 }
  0xc9   :  { %v133_v21 = vadd.f32 %v124_v12, %v101_v14  ;;  %v93_v22 = vadd.f32 %v220_v15, %v92_v18 }
  0xca   :  { %v243_v20 = vpop.f32.mrf.mxu0 }
  0xcb   :  { %v104_v23 = vadd.f32 %v243_v20, %v225_v16  ;;  %v137_v29 = vmax.f32 %v133_v21, 0.0  ;;  %v131_v30 = vadd.f32 %v114_v17, %v93_v22 }
  0xcc   :  { %v95_v25 = vpop.f32.mrf.mxu0 }
  0xcd   :  { %v134_v26 = vadd.f32 %v129_v24, %v104_v23  ;;  %v96_v27 = vadd.f32 %v221_v19, %v95_v25  ;;  %v135_v35 = vmax.f32 %v131_v30, 0.0 }
  0xcf   :  { %v138_v31 = vmax.f32 %v134_v26, 0.0  ;;  %v132_v32 = vadd.f32 %v119_v28, %v96_v27 }
  0xd1   :  { %v136_v33 = vmax.f32 %v132_v32, 0.0  ;;  %v142_v34 = vpack.c.bf16 %v138_v31, %v137_v29 }
  0xd3   :  { %245 = vmatpush3.bf16.msra.mxu1 %v142_v34  ;;  %v141_v36 = vpack.c.bf16 %v136_v33, %v135_v35 }
  0xd4   :  { %246 = vmatprep.subr.bf16.mxu1 %v262_v8 }
  0xd7   :  { %247 = vmatpush3.bf16.msra.mxu1 %v141_v36 }
  0xda   :  { %249 = vmatmul.mubr.msk.bf16.vlgmr.msra.gmra.mxu1 %vm148_vm2, %v260_v37 }
 0x19a   :  { %v186_v38 = vpop.f32.mrf.mxu1 }
 0x19c   :  { %v250_v39 = vpop.f32.mrf.mxu1 }
 0x19e   :  { %v189_v40 = vpop.f32.mrf.mxu1 }
 0x19f   :  { %v229_v41 = vpack.c.bf16 %v189_v40, %v186_v38 }
 0x1a0   :  { %v251_v42 = vpop.f32.mrf.mxu1 }
 0x1a1   :  { %230 = vst [vmem:[%s334_s5] sm:$0xff] %v229_v41  }

// kernel: tempsal_forward.17
= control target key start
LH: loop header
LB: loop body
LE: loop exit
PB: predicated region body
PF: predicated region fallthrough
CT: control target
= control target key end

     0   :  { %v13_v0 = vlaneseq  ;;  %v47_v1 = vmov 1983009808   ;;  %vm20_vm0 = vcmask 1041408   ;;  %v48_v12 = vmov 269488144   ;;  %s65_s0 = inlined_call_operand.vmem [shape: f32[2,256], index: 0, kind: input, shape index: {}]   ;;  %s66_s1 = inlined_call_operand.vmem [shape: f32[2,256], index: 1, kind: output, shape index: {}]  }
   0x1   :  { %v11_v2 = vunpack.c.l.s4 %v47_v1  ;;  %v8_v5 = vld [vmem:[%s65_s0] sm:$0xf]  ;;  %v29_v13 = vunpack.c.l.s4 %v48_v12 }
   0x2   :  { %v14_v3 = vshrl.u32 %v13_v0, 7 }
   0x3   :  { %v12_v4 = vunpack.c.0.s8 %v11_v2  ;;  %v30_v14 = vunpack.c.0.s8 %v29_v13 }
   0x5   :  { %v15_v6 = vsub.s32 %v12_v4, %v14_v3  ;;  %v33_v15 = vsub.s32 %v30_v14, %v14_v3 }
   0x7   :  { %v16_v7 = vrot.slane %v8_v5, %v15_v6 }
   0x9   :  { %v17_v8 = vcombine.high %v16_v7, %v16_v7  ;;  %v21_v9 = vsel %vm20_vm0, %v16_v7, -inf }
   0xb   :  { %v22_v10 = vsel %vm20_vm0, %v17_v8, -inf }
   0xc   :  { %v23_v11 = vmax.f32 %v21_v9, %v22_v10 }
   0xe   :  { %24 = vmax.xlane.f32.xlu0 %v23_v11 }
  0x97   :  { %v25_v16 = vpop.xlane.xlu0 %24 }
  0x98   :  { %v26_v17 = vadd.f32 1e-06, %v25_v16 }
  0x9a   :  { %v34_v18 = vrot.slane %v26_v17, %v33_v15 }
  0x9c   :  { %45 = vrcp.f32 %v34_v18 }
  0xa9   :  { %v46_v19 = vpop.eup %45 }
  0xaa   :  { %v37_v20 = vmul.f32 %v46_v19, %v8_v5 }
  0xac   :  { %38 = vst [vmem:[%s66_s1] sm:$0xf] %v37_v20 }

// kernel: tempsal_forward.16
= control target key start
LH: loop header
LB: loop body
LE: loop exit
PB: predicated region body
PF: predicated region fallthrough
CT: control target
= control target key end

     0   :  { %s1295_s0 = inlined_call_operand.vmem [shape: bf16[8,512], index: 0, kind: input, shape index: {}]   ;;  %s1296_s1 = inlined_call_operand.vmem [shape: bf16[16,512], index: 1, kind: input, shape index: {}]   ;;  %s1297_s2 = inlined_call_operand.vmem [shape: bf16[16,8], index: 2, kind: input, shape index: {}]   ;;  %s1298_s3 = inlined_call_operand.vmem [shape: f32[16,1], index: 3, kind: input, shape index: {}]   ;;  %s1299_s4 = inlined_call_operand.vmem [shape: bf16[5,16], index: 4, kind: input, shape index: {}]   ;;  %s1300_s5 = inlined_call_operand.vmem [shape: f32[5,1], index: 5, kind: input, shape index: {}]   ;;  %s1301_s6 = inlined_call_operand.vmem [shape: bf16[1,16], index: 6, kind: input, shape index: {}]   ;;  %s1302_s7 = inlined_call_operand.<no memory space> [shape: f32[1,1], index: 7, kind: input, shape index: {}, may-alias: {7,13}]   ;;  %s1303_s8 = inlined_call_operand.vmem [shape: bf16[8,8], index: 8, kind: input, shape index: {}]   ;;  %s1304_s9 = inlined_call_operand.vmem [shape: bf16[8,5], index: 9, kind: input, shape index: {}]   ;;  %s1305_s10 = inlined_call_operand.vmem [shape: f32[8,1], index: 10, kind: input, shape index: {}]   ;;  %s1306_s11 = inlined_call_operand.vmem [shape: f32[8,1], index: 11, kind: input, shape index: {}]   ;;  %s1307_s12 = inlined_call_operand.vmem [shape: bf16[1,8], index: 12, kind: input, shape index: {}]   ;;  %s1308_s14 = inlined_call_operand.vmem [shape: f32[1,512], index: 14, kind: output, shape index: {}]   ;;  %s1309_s13 = inlined_call_operand.<no memory space> [shape: f32[1,1], index: 13, kind: input, shape index: {}, may-alias: {7,13}]  }
   0x1   :  { %v19_v0 = vstv %s1302_s7  ;;  %v21_v1 = vstv %s1309_s13 }
   0x2   :  { %20 = vst [vmem:[#allocation2] sm:$0x1] %v19_v0  ;;  %22 = vst [vmem:[#allocation3] sm:$0x1] %v21_v1 }
   0x3   :  { %s1178_s17 = smov 0   ;;  %s1180_s18 = smov 0  }
   0x4   :  { %s1182_s19 = smov 0  }
   0x5 LB: > { %s963_s7 = sadd.s32 4294967295, %s1091_s19   ;;  %s1195_s13 = sadd.s32 1, %s1091_s19   ;;  %s1091_s19 = sphi %s1182_s19, %s1312_s19   ;;  %s1087_s18 = sphi %s1180_s18, %s1311_s18   ;;  %s1083_s17 = sphi %s1178_s17, %s1310_s17  }
   0x6   : > { %s58_s20 = ssub.s32 %s1091_s19, %s1195_s13  ;;  %s61_s21 = sadd.s32 1, %s1087_s18 }
   0x7   : > { %p59_p0 = scmp.eq.s32.totalorder %s58_s20, 0  ;;  %p68_p1 = scmp.ne.s32.totalorder %s1087_s18, %s1083_s17 }
   0x8   : > { %p69_p2 = scmp.eq.s32.totalorder %s1091_s19, 0  ;;  %p966_p4 = scmp.ge.s32.totalorder %s1091_s19, 4 }
   0x9   : > { %s1204_s22 = scalar_select %p59_p0, %s1087_s18, %s61_s21  }
   0xa   : > { %p70_p3 = por %p69_p2, %p68_p1  ;;  %408 = sbr.rel (%p966_p4) target bundleno = 20 (0x14), region = 64 }
   0xf   : > { %418 = sbr.rel (!%p70_p3) target bundleno = 20 (0x14), region = 72  ;;  %s420_s23 = sand.u32 (%p70_p3), 1, %s1087_s18  }
  0x10   : > { %s968_s24 = sshll.u32 (%p70_p3), %s1091_s19, 2  ;;  %s967_s25 = sshll.u32 (%p70_p3), %s420_s23, 3 }
  0x11   : > { %s424_s28 = scalar_lea.vmem (%p70_p3), %s1296_s1, %s968_s24  ;;  %s422_s29 = scalar_lea.vmem (%p70_p3), [#allocation4], %s967_s25 }
  0x12   : > { %v441_v2 = vld [vmem:[%s424_s28] sm:$0xf] (%p70_p3)  ;;  %v443_v3 = vld [vmem:[%s424_s28 + $0x10] sm:$0xf] (%p70_p3) }
  0x13   : > { %442 = vst [vmem:[%s422_s29] sm:$0xf] (%p70_p3), %v441_v2  ;;  %444 = vst [vmem:[%s422_s29 + $0x4] sm:$0xf] (%p70_p3), %v443_v3 }
  0x14 PF: > { %p969_p5 = scmp.ge.s32.totalorder %s1091_s19, 1  ;;  %p471_p6 = scmp.lt.s32.totalorder %s1091_s19, 5 }
  0x16   : > { %p472_p7 = pnand %p969_p5, %p471_p6 }
  0x17   : > { %p525_p8 = scmp.lt.s32.totalorder (!%p472_p7), %s963_s7, 3  ;;  %s478_s20 = sand.u32 (!%p472_p7), 1, %s1083_s17  }
  0x18   : > { %475 = sbr.rel (%p472_p7) target bundleno = 882 (0x372), region = 113  ;;  %s970_s21 = sshll.u32 (!%p472_p7), %s478_s20, 3 }
  0x19   : > { %s480_s23 = scalar_lea.vmem (!%p472_p7), [#allocation4], %s970_s21 }
  0x1d   : > { %v1093_v4 = vmov 0.0   ;;  %vm1094_vm0 = vmmov 0   ;;  %v594_v5 = vld [vmem:[%s1298_s3] sm:$0xff]  ;;  %s1314_s7 = smov (!%p525_p8, %s963_s7), 3  ;;  %v1095_v6 = vmov 0   ;;  %vm549_vm1 = vcmask 1043456  }
  0x1e   : > { %998 = vmatprep.subr.bf16.mxu0 %v1093_v4  ;;  %1000 = vmatprep.mubr.msk.bf16.mxu0 %vm1094_vm0, %v1093_v4  ;;  %s971_s16 = sshll.u32 %s1314_s7, 2  ;;  %v595_v7 = vld [vmem:[%s1298_s3 + $0x8] sm:$0xff]  ;;  %v1064_v10 = vld [vmem:[%s1297_s2] sm:$0xff]   ;;  %vm545_vm2 = vcmask 64512   ;;  %vm618_vm3 = vcmask 130048   ;;  %vm723_vm4 = vcmask 1041408   ;;  %v669_v55 = vlaneseq  ;;  %s531_s21 = scalar_lea.vmem %s1308_s14, %s1314_s7 }
  0x1f   : > { %1062 = vset.pattern.permute.xlu0 %v1095_v6  ;;  %1004 = vmatprep.subr.bf16.mxu1 %v1093_v4  ;;  %s528_s24 = scalar_lea.vmem %s1295_s0, %s971_s16  ;;  %v813_v11 = vld [vmem:[%s1305_s10] sm:$0xff]  ;;  %vm724_vm5 = vcmask 1042432   ;;  %v1096_v36 = vmov 65535   ;;  %vm719_vm6 = vcmask 39936  }
  0x20   : > { %598 = vperm.xlu0 %1062, %v594_v5   ;;  %1006 = vmatprep.mubr.msk.bf16.mxu1 %vm1094_vm0, %v1093_v4  ;;  %v533_v8 = vld [vmem:[%s528_s24] sm:$0xf]  ;;  %v725_v37 = vsel %vm723_vm4, 4294967295, %v1096_v36  ;;  %v670_v56 = vshrl.u32 %v669_v55, 7 }
  0x21   : > { %1063 = vset.pattern.permute.xlu1 %v1095_v6  ;;  %v551_v9 = vsel %vm549_vm1, %v533_v8, 0  ;;  %v835_v12 = vld [vmem:[#allocation3] sm:$0x1]  ;;  %v663_v14 = vld [vmem:[#allocation2] sm:$0x1]  ;;  %v983_v16 = vld [vmem:[%s480_s23] sm:$0xff]  }
  0x22   : > { %999 = vmatpush3.bf16.msra.mxu0 %v551_v9  ;;  %v612_v13 = vld [vmem:[%s1300_s5] sm:$0x1f]  ;;  %v984_v17 = vunpack.c.l.bf16 %v983_v16  ;;  %v985_v21 = vunpack.c.h.bf16 %v983_v16  ;;  %v726_v41 = vsel %vm724_vm5, %v725_v37, 0  ;;  %v671_v57 = vsub.s32 0, %v670_v56 }
  0x23   : > { %1010 = vmatprep.subr.bf16.mxu0 %v1093_v4  ;;  %615 = vperm.xlu1 %1063, %v612_v13   ;;  %v825_v15 = vld [vmem:[%s1306_s11] sm:$0xff] }
  0x24   : > { %603 = vperm.xlu0 %1062, %v595_v7   ;;  %v611_v32 = vld [vmem:[%s1299_s4] sm:$0x7] }
  0x25   : > { %1001 = vmatmul.mubr.msk.bf16.vlgmr.msra.gmra.mxu0 %vm545_vm2, %v1064_v10  ;;  %v662_v33 = vld [vmem:[%s1301_s6] sm:$0x1] }
  0x26   : > { %1012 = vmatprep.mubr.msk.bf16.mxu0 %vm1094_vm0, %v1093_v4  ;;  %v716_v34 = vld [vmem:[%s1303_s8] sm:$0xf] }
  0x27   : > { %666 = vperm.xlu1 %1063, %v663_v14   ;;  %v717_v50 = vld [vmem:[%s1304_s9] sm:$0xf] }
  0x28   : > { %816 = vperm.xlu0 %1062, %v813_v11   ;;  %v833_v11 = vld [vmem:[%s1307_s12] sm:$0x1] }
  0x2b   : > { %828 = vperm.xlu1 %1063, %v825_v15  }
  0x2c   : > { %838 = vperm.xlu0 %1062, %v835_v12  }
  0x9b   : > { %v599_v18 = vpop.permute.xlu0 %598 }
  0x9e   : > { %v616_v35 = vpop.permute.xlu1 %615 }
  0x9f   : > { %v604_v26 = vpop.permute.xlu0 %603 }
  0xa2   : > { %v667_v58 = vpop.permute.xlu1 %666 }
  0xa3   : > { %v672_v59 = vrot.slane %v667_v58, %v671_v57  ;;  %v817_v62 = vpop.permute.xlu0 %816 }
  0xa6   : > { %v829_v5 = vpop.permute.xlu1 %828 }
  0xa7   : > { %v839_v12 = vpop.permute.xlu0 %838 }
  0xa8   : > { %v844_v13 = vrot.slane %v839_v12, %v671_v57 }
  0xe5   : > { %v587_v19 = vpop.f32.mrf.mxu0 }
  0xe6   : > { %v588_v20 = vadd.f32 %v984_v17, %v587_v19 }
  0xe7   : > { %v1002_v22 = vpop.f32.mrf.mxu0 }
  0xe8   : > { %v606_v24 = vadd.f32 %v599_v18, %v588_v20 }
  0xe9   : > { %v590_v23 = vpop.f32.mrf.mxu0 }
  0xea   : > { %v591_v25 = vadd.f32 %v985_v21, %v590_v23  ;;  %v608_v29 = vmax.f32 %v606_v24, 0.0 }
  0xeb   : > { %v1003_v27 = vpop.f32.mrf.mxu0 }
  0xec   : > { %v607_v28 = vadd.f32 %v604_v26, %v591_v25 }
  0xee   : > { %v609_v30 = vmax.f32 %v607_v28, 0.0 }
  0xf0   : > { %v610_v31 = vpack.c.bf16 %v609_v30, %v608_v29 }
  0xf2   : > { %1005 = vmatpush3.bf16.msra.mxu1 %v610_v31  ;;  %1011 = vmatpush3.bf16.msra.mxu0 %v610_v31 }
  0xf3   : > { %1022 = vmatprep.subr.bf16.mxu0 %v1093_v4  ;;  %1016 = vmatprep.subr.bf16.mxu1 %v1093_v4 }
  0xf5   : > { %1007 = vmatmul.mubr.msk.bf16.vlgmr.msra.gmra.mxu1 %vm618_vm3, %v611_v32  ;;  %1013 = vmatmul.mubr.msk.bf16.vlgmr.msra.gmra.mxu0 %vm618_vm3, %v662_v33 }
  0xf6   : > { %1023 = vmatpush3.bf16.msra.mxu0 %v551_v9  ;;  %1024 = vmatprep.mubr.msk.bf16.mxu0 %vm1094_vm0, %v1093_v4 }
  0xf7   : > { %1018 = vmatprep.mubr.msk.bf16.mxu1 %vm1094_vm0, %v1093_v4 }
  0xfd   : > { %1025 = vmatmul.mubr.msk.bf16.vlgmr.msra.gmra.mxu0 %vm545_vm2, %v716_v34 }
 0x1b5   : > { %v656_v38 = vpop.f32.mrf.mxu1  ;;  %v710_v39 = vpop.f32.mrf.mxu0 }
 0x1b6   : > { %v657_v40 = vadd.f32 %v656_v38, %v616_v35  ;;  %v711_v60 = vadd.f32 %v710_v39, %v672_v59 }
 0x1b7   : > { %v1008_v42 = vpop.f32.mrf.mxu1  ;;  %v1014_v43 = vpop.f32.mrf.mxu0 }
 0x1b8   : > { %v718_v44 = vpack.c.bf16 %v657_v40, %v657_v40  ;;  %v822_v61 = vrot.slane %v711_v60, %v671_v57 }
 0x1b9   : > { %v659_v45 = vpop.f32.mrf.mxu1  ;;  %v713_v46 = vpop.f32.mrf.mxu0 }
 0x1ba   : > { %v728_v47 = vand.u32 %v726_v41, %v718_v44  ;;  %v823_v1 = vmul.f32 %v822_v61, %v817_v62 }
 0x1bb   : > { %v1009_v48 = vpop.f32.mrf.mxu1  ;;  %v1015_v49 = vpop.f32.mrf.mxu0 }
 0x1bc   : > { %1017 = vmatpush3.bf16.msra.mxu1 %v728_v47 }
 0x1bd   : > { %1028 = vmatprep.subr.bf16.mxu1 %v1093_v4  ;;  %v807_v51 = vpop.f32.mrf.mxu0 }
 0x1bf   : > { %1019 = vmatmul.mubr.msk.bf16.vlgmr.msra.gmra.mxu1 %vm719_vm6, %v717_v50  ;;  %v1026_v52 = vpop.f32.mrf.mxu0 }
 0x1c0   : > { %1030 = vmatprep.mubr.msk.bf16.mxu1 %vm1094_vm0, %v1093_v4 }
 0x1c1   : > { %v810_v53 = vpop.f32.mrf.mxu0 }
 0x1c3   : > { %v1027_v54 = vpop.f32.mrf.mxu0 }
 0x27f   : > { %v764_v63 = vpop.f32.mrf.mxu1 }
 0x280   : > { %v808_v0 = vadd.f32 %v807_v51, %v764_v63 }
 0x281   : > { %v1020_v2 = vpop.f32.mrf.mxu1 }
 0x282   : > { %v824_v3 = vadd.f32 %v823_v1, %v808_v0 }
 0x283   : > { %v767_v6 = vpop.f32.mrf.mxu1 }
 0x284   : > { %v831_v4 = vadd.f32 %v829_v5, %v824_v3 }
 0x285   : > { %v1021_v7 = vpop.f32.mrf.mxu1 }
 0x286   : > { %v832_v8 = vmax.f32 %v831_v4, 0.0 }
 0x288   : > { %v834_v9 = vpack.c.bf16 %v832_v8, %v832_v8 }
 0x28a   : > { %v849_v10 = vsel %vm549_vm1, %v834_v9, 0 }
 0x28b   : > { %1029 = vmatpush3.bf16.msra.mxu1 %v849_v10 }
 0x28e   : > { %1031 = vmatmul.mubr.msk.bf16.vlgmr.msra.gmra.mxu1 %vm545_vm2, %v833_v11 }
 0x34e   : > { %v885_v14 = vpop.f32.mrf.mxu1 }
 0x34f   : > { %v886_v15 = vadd.f32 %v885_v14, %v844_v13 }
 0x350   : > { %v1032_v16 = vpop.f32.mrf.mxu1 }
 0x351   : > { %v979_v17 = vmul.f32 -1.442695, %v886_v15 }
 0x352   : > { %v888_v18 = vpop.f32.mrf.mxu1 }
 0x353   : > { %1065 = vpow2.f32 %v979_v17 }
 0x354   : > { %v1033_v19 = vpop.f32.mrf.mxu1 }
 0x360   : > { %v1066_v20 = vpop.eup %1065 }
 0x361   : > { %v894_v21 = vadd.f32 1.0, %v1066_v20 }
 0x363   : > { %1067 = vrcp.f32 %v894_v21 }
 0x370   : > { %v1068_v22 = vpop.eup %1067 }
 0x371   : > { %897 = vst [vmem:[%s531_s21] sm:$0x1] %v1068_v22 }
 0x372 PF: > { %p25_p9 = scmp.ge.s32.totalorder %s1195_s13, 6   ;;  %s1310_s17 = smov %s1087_s18 }
 0x373   : > { %s1311_s18 = smov %s1204_s22  ;;  %s1312_s19 = smov %s1195_s13 }
 0x374   :  { %27 = sbr.rel (!%p25_p9) target bundleno = 5 (0x5), region = 155 }

</bundles_post_ra>
